<compile_context>
chip_gen: v7x
topology: tpu7x:2x2x1
jax: 0.10.0
libtpu: 0.0.40
codegen_flags: <defaults>
</compile_context>

<pallas_src>
import functools

import jax
import jax.numpy as jnp
from jax.experimental import pallas as pl
from jax.experimental.pallas import tpu as pltpu


def _vmem_capacity_bytes():
    """Physical VMEM of the current chip (conservative fallback = v7x 64 MiB)."""
    try:
        cap = getattr(pltpu.get_tpu_info(), "vmem_capacity_bytes", None)
        if cap:
            return int(cap)
    except Exception:
        pass
    return 64 << 20


def _step_vmem_bytes(tb, N, C, in_itemsize):
    """Rough per-grid-step VMEM footprint for a batch tile of tb rows."""
    rows = tb * N
    io = 2 * (rows * C + 2 * tb * C) * in_itemsize      # double-buffered x, z_t, out
    inter = 10 * rows * C * 4                           # f32 intermediates (rough)
    weights = 2 * (5 * C * C + 6 * C) * 4               # double-buffered constants
    return io + inter + weights


def _pick_batch_tile(B, N, C, in_itemsize, vmem_budget):
    """Batch tile: VMEM-bounded; >=2 grid steps whenever B allows it (v7x has
    two TensorCores and "parallel" only shards grids with >=2 steps);
    sublane-aligned multiples of 8 preferred."""
    divisors = [d for d in range(1, B + 1) if B % d == 0]
    fits = [d for d in divisors if _step_vmem_bytes(d, N, C, in_itemsize) <= vmem_budget]
    if not fits:
        fits = [1]
    aligned_multi = [d for d in fits if d % 8 == 0 and B // d >= 2]
    if aligned_multi:
        return max(aligned_multi)
    multi = [d for d in fits if B // d >= 2]
    if multi:
        return max(multi)
    return max(fits)


def _denoise_kernel(z_ref, x_ref, g_ref, b_ref, bd_ref,
                    wq_ref, wk_ref, wv_ref, wp_ref,
                    bq_ref, bk_ref, bv_ref, bp_ref,
                    out_ref, *, head_dim, eps, approx_recip):
    f32 = jnp.float32
    TB, C = z_ref.shape
    RN = x_ref.shape[0]          # TB * N  (x rows arrive pre-flattened)
    N = RN // TB
    mm = wq_ref.dtype            # MXU operand dtype chosen by the wrapper

    z = z_ref[...].astype(f32)   # (TB, C)   raw z_t rows (residual uses these)
    xf = x_ref[...].astype(f32)  # (TB*N, C) raw x rows

    gamma = g_ref[...].astype(f32)
    beta = b_ref[...].astype(f32)

    def layer_norm(t):
        mu = jnp.mean(t, axis=-1, keepdims=True)
        var = jnp.mean((t - mu) ** 2, axis=-1, keepdims=True)
        return (t - mu) * jax.lax.rsqrt(var + eps) * gamma + beta

    hz = layer_norm(z).astype(mm)      # (TB, C)
    hx = layer_norm(xf).astype(mm)     # (TB*N, C)

    wq = wq_ref[...]
    wk = wk_ref[...]
    wv = wv_ref[...]
    bq = bq_ref[...].astype(f32)
    bk = bk_ref[...].astype(f32)
    bv = bv_ref[...].astype(f32)

    # z-row projections (TB rows, tiny).  Queries only exist for the z token;
    # the softmax scale is folded into q once.
    scale = head_dim ** (-0.5)
    q = (jnp.dot(hz, wq, preferred_element_type=f32) + bq) * scale    # (TB, C)
    k0 = jnp.dot(hz, wk, preferred_element_type=f32) + bk             # (TB, C)
    v0 = jnp.dot(hz, wv, preferred_element_type=f32) + bv             # (TB, C)

    # x-row projections (dominant matmuls): K and V only, never Q.
    kx = jnp.dot(hx, wk, preferred_element_type=f32) + bk             # (TB*N, C)
    vx = jnp.dot(hx, wv, preferred_element_type=f32) + bv             # (TB*N, C)
    kx3 = kx.reshape(TB, N, C)
    vx3 = vx.reshape(TB, N, C)

    # Per-head scores via ONE block-diagonal ones matmul: every channel of a
    # head carries that head's score, so the whole softmax stays C lanes wide
    # (no reduce-to-H / expand-to-C pair, no 3-live-lane vregs).
    bd = bd_ref[...]                                                  # (C, C)
    s0 = jnp.dot((q * k0).astype(mm), bd, preferred_element_type=f32)             # (TB, C)
    sx = jnp.dot((q[:, None, :] * kx3).reshape(RN, C).astype(mm), bd,
                 preferred_element_type=f32).reshape(TB, N, C)                    # (TB, N, C)

    # numerically stable softmax over the 1 + N key tokens (all f32)
    m_max = jnp.maximum(s0, jnp.max(sx, axis=1))                      # (TB, C)
    p0 = jnp.exp(s0 - m_max)                                          # (TB, C)
    px = jnp.exp(sx - m_max[:, None, :])                              # (TB, N, C)
    denom = p0 + jnp.sum(px, axis=1)                                  # (TB, C)
    inv = pl.reciprocal(denom, approx=approx_recip)                   # EUP, not VALU

    attn = (p0 * v0 + jnp.sum(px * vx3, axis=1)) * inv                # (TB, C)

    # output projection + residual with the raw z_t row.
    proj = (jnp.dot(attn.astype(mm), wp_ref[...], preferred_element_type=f32)
            + bp_ref[...].astype(f32))
    # NOTE: a lane-dense (1, TB*C) output slab only pays off for large B
    # (conditional review item); keep the simple (TB, C) block here.
    out_ref[...] = (z + proj).astype(out_ref.dtype)


def denoising_block(x, z_t, params, *, num_heads=3, eps=1e-5,
                    matmul_dtype=jnp.bfloat16, approx_recip=True):
    """x: (B, N, C), z_t: (B, C) -> (B, C).  Matches DenoisingBlock.forward
    (dropout layers are eval-mode identities)."""
    B, N, C = x.shape
    assert C % num_heads == 0
    head_dim = C // num_heads

    in_itemsize = jnp.dtype(x.dtype).itemsize
    phys_vmem = _vmem_capacity_bytes()
    TB = _pick_batch_tile(B, N, C, in_itemsize, (phys_vmem * 3) // 5)
    G = B // TB

    f32 = jnp.float32
    mm = matmul_dtype
    # pre-transposed (in, out) weights, cast once to the MXU operand dtype.
    wq_t = params["wq"].T.astype(mm)
    wk_t = params["wk"].T.astype(mm)
    wv_t = params["wv"].T.astype(mm)
    wp_t = params["wp"].T.astype(mm)
    bq = params["bq"].reshape(1, C).astype(f32)
    bk = params["bk"].reshape(1, C).astype(f32)
    bv = params["bv"].reshape(1, C).astype(f32)
    bp = params["bp"].reshape(1, C).astype(f32)
    gamma = params["ln_g"].reshape(1, C).astype(f32)
    beta = params["ln_b"].reshape(1, C).astype(f32)

    # block-diagonal "same head" ones matrix, built once outside the kernel.
    head_of = jnp.arange(C) // head_dim
    bd = (head_of[:, None] == head_of[None, :]).astype(mm)            # (C, C)

    x_flat = x.reshape(B * N, C)          # rows of batch b stay contiguous

    kernel = functools.partial(_denoise_kernel, head_dim=head_dim, eps=eps,
                               approx_recip=approx_recip)

    const = lambda shape: pl.BlockSpec(shape, lambda i: (0, 0))

    out = pl.pallas_call(
        kernel,
        out_shape=jax.ShapeDtypeStruct((B, C), x.dtype),
        grid_spec=pltpu.PrefetchScalarGridSpec(
            num_scalar_prefetch=0,
            grid=(G,),
            in_specs=[
                pl.BlockSpec((TB, C), lambda i: (i, 0)),       # z_t
                pl.BlockSpec((TB * N, C), lambda i: (i, 0)),   # x (flattened rows)
                const((1, C)),                                 # ln gamma
                const((1, C)),                                 # ln beta
                const((C, C)),                                 # head block-diag ones
                const((C, C)),                                 # Wq^T
                const((C, C)),                                 # Wk^T
                const((C, C)),                                 # Wv^T
                const((C, C)),                                 # Wproj^T
                const((1, C)),                                 # bq
                const((1, C)),                                 # bk
                const((1, C)),                                 # bv
                const((1, C)),                                 # bproj
            ],
            out_specs=pl.BlockSpec((TB, C), lambda i: (i, 0)),
        ),
        compiler_params=pltpu.CompilerParams(
            dimension_semantics=("parallel",),
            vmem_limit_bytes=int(max(32 << 20, (phys_vmem * 3) // 4)),
        ),
    )(z_t, x_flat, gamma, beta, bd, wq_t, wk_t, wv_t, wp_t, bq, bk, bv, bp)

    return out


def denoising_block_ref(x, z_t, params, *, num_heads=3, eps=1e-5):
    """Pure-JAX reference mirroring the PyTorch forward (dropouts are eval/identity)."""
    B, N, C = x.shape
    head_dim = C // num_heads
    xin = jnp.concatenate([z_t[:, None, :], x], axis=1)   # (B, M, C)

    mean = jnp.mean(xin, axis=-1, keepdims=True)
    var = jnp.mean((xin - mean) ** 2, axis=-1, keepdims=True)
    h = (xin - mean) / jnp.sqrt(var + eps) * params["ln_g"] + params["ln_b"]

    q = h[:, 0:1] @ params["wq"].T + params["bq"]          # (B, 1, C)
    k = h @ params["wk"].T + params["bk"]                  # (B, M, C)
    v = h @ params["wv"].T + params["bv"]

    def split(t):
        Bv, Mv, _ = t.shape
        return t.reshape(Bv, Mv, num_heads, head_dim).transpose(0, 2, 1, 3)

    qh, kh, vh = split(q), split(k), split(v)              # (B, H, *, Dh)
    attn = (qh @ jnp.swapaxes(kh, -2, -1)) * head_dim ** (-0.5)
    attn = jax.nn.softmax(attn, axis=-1)
    out = (attn @ vh).transpose(0, 2, 1, 3).reshape(B, 1, C)
    out = out @ params["wp"].T + params["bp"]
    return (xin[:, 0:1] + out)[:, 0]


def make_params(key, dim):
    ks = jax.random.split(key, 8)
    scale = 0.02
    return {
        "ln_g": jnp.ones((dim,), jnp.float32),
        "ln_b": jnp.zeros((dim,), jnp.float32),
        "wq": scale * jax.random.normal(ks[0], (dim, dim), jnp.float32),
        "bq": scale * jax.random.normal(ks[1], (dim,), jnp.float32),
        "wk": scale * jax.random.normal(ks[2], (dim, dim), jnp.float32),
        "bk": scale * jax.random.normal(ks[3], (dim,), jnp.float32),
        "wv": scale * jax.random.normal(ks[4], (dim, dim), jnp.float32),
        "bv": scale * jax.random.normal(ks[5], (dim,), jnp.float32),
        "wp": scale * jax.random.normal(ks[6], (dim, dim), jnp.float32),
        "bp": scale * jax.random.normal(ks[7], (dim,), jnp.float32),
    }


if __name__ == "__main__":
    # embed_dim divisible by num_heads=3 (head_dim=16); B=16 gives a 2-step
    # grid with sublane-aligned (8, C) batch tiles (megacore-friendly on v7x).
    B, N, C = 16, 8, 48
    key = jax.random.PRNGKey(0)
    kx, kz, kp = jax.random.split(key, 3)

    x = jax.random.normal(kx, (B, N, C), jnp.float32)
    z_t = jax.random.normal(kz, (B, C), jnp.float32)
    params = make_params(kp, C)

    ref = denoising_block_ref(x, z_t, params)

    # exact path (f32 MXU operands, exact reciprocal) — matches the f32 module
    out_exact = jax.block_until_ready(
        denoising_block(x, z_t, params, matmul_dtype=jnp.float32,
                        approx_recip=False))
    assert out_exact.shape == (B, C)
    assert jnp.allclose(out_exact, ref, atol=1e-4, rtol=1e-4), (
        float(jnp.max(jnp.abs(out_exact - ref))))

    # fast path (bf16 MXU operands + EUP approx reciprocal, f32 accumulation)
    out_fast = jax.block_until_ready(denoising_block(x, z_t, params))
    assert out_fast.shape == (B, C)
    assert jnp.allclose(out_fast, ref, atol=2e-2, rtol=2e-2), (
        float(jnp.max(jnp.abs(out_fast - ref))))

    print("KERNEL_OK")
</pallas_src>

<mosaic_0001>
module attributes {stable_mosaic.version = 11 : i64} {
  func.func @_denoise_kernel(%arg0: i32, %arg1: memref<8x48xf32, #tpu.memory_space<vmem>>, %arg2: memref<64x48xf32, #tpu.memory_space<vmem>>, %arg3: memref<1x48xf32, #tpu.memory_space<vmem>>, %arg4: memref<1x48xf32, #tpu.memory_space<vmem>>, %arg5: memref<48x48xf32, #tpu.memory_space<vmem>>, %arg6: memref<48x48xf32, #tpu.memory_space<vmem>>, %arg7: memref<48x48xf32, #tpu.memory_space<vmem>>, %arg8: memref<48x48xf32, #tpu.memory_space<vmem>>, %arg9: memref<48x48xf32, #tpu.memory_space<vmem>>, %arg10: memref<1x48xf32, #tpu.memory_space<vmem>>, %arg11: memref<1x48xf32, #tpu.memory_space<vmem>>, %arg12: memref<1x48xf32, #tpu.memory_space<vmem>>, %arg13: memref<1x48xf32, #tpu.memory_space<vmem>>, %arg14: memref<8x48xf32, #tpu.memory_space<vmem>>) attributes {dimension_semantics = [#tpu.dimension_semantics<parallel>], iteration_bounds = array<i64: 2>, scalar_prefetch = 0 : i64, scratch_operands = 0 : i64, tpu.core_type = #tpu.core_type<tc>, window_params = [{transform_indices = @transform_0, window_bounds = array<i64: 8, 48>}, {transform_indices = @transform_1, window_bounds = array<i64: 64, 48>}, {pipeline_mode = #tpu.pipeline_mode<synchronous>, transform_indices = @transform_2, window_bounds = array<i64: 1, 48>}, {pipeline_mode = #tpu.pipeline_mode<synchronous>, transform_indices = @transform_3, window_bounds = array<i64: 1, 48>}, {pipeline_mode = #tpu.pipeline_mode<synchronous>, transform_indices = @transform_4, window_bounds = array<i64: 48, 48>}, {pipeline_mode = #tpu.pipeline_mode<synchronous>, transform_indices = @transform_5, window_bounds = array<i64: 48, 48>}, {pipeline_mode = #tpu.pipeline_mode<synchronous>, transform_indices = @transform_6, window_bounds = array<i64: 48, 48>}, {pipeline_mode = #tpu.pipeline_mode<synchronous>, transform_indices = @transform_7, window_bounds = array<i64: 48, 48>}, {pipeline_mode = #tpu.pipeline_mode<synchronous>, transform_indices = @transform_8, window_bounds = array<i64: 48, 48>}, {pipeline_mode = #tpu.pipeline_mode<synchronous>, transform_indices = @transform_9, window_bounds = array<i64: 1, 48>}, {pipeline_mode = #tpu.pipeline_mode<synchronous>, transform_indices = @transform_10, window_bounds = array<i64: 1, 48>}, {pipeline_mode = #tpu.pipeline_mode<synchronous>, transform_indices = @transform_11, window_bounds = array<i64: 1, 48>}, {pipeline_mode = #tpu.pipeline_mode<synchronous>, transform_indices = @transform_12, window_bounds = array<i64: 1, 48>}, {transform_indices = @transform_13, window_bounds = array<i64: 8, 48>}]} {
    %c0 = arith.constant 0 : index
    %c0_0 = arith.constant 0 : index
    %0 = vector.load %arg1[%c0, %c0_0] : memref<8x48xf32, #tpu.memory_space<vmem>>, vector<8x48xf32>
    %c0_1 = arith.constant 0 : index
    %c0_2 = arith.constant 0 : index
    %1 = vector.load %arg2[%c0_1, %c0_2] : memref<64x48xf32, #tpu.memory_space<vmem>>, vector<64x48xf32>
    %c0_3 = arith.constant 0 : index
    %c0_4 = arith.constant 0 : index
    %2 = vector.load %arg3[%c0_3, %c0_4] : memref<1x48xf32, #tpu.memory_space<vmem>>, vector<1x48xf32>
    %c0_5 = arith.constant 0 : index
    %c0_6 = arith.constant 0 : index
    %3 = vector.load %arg4[%c0_5, %c0_6] : memref<1x48xf32, #tpu.memory_space<vmem>>, vector<1x48xf32>
    %cst = arith.constant dense<0.000000e+00> : vector<8xf32>
    %4 = vector.multi_reduction <add>, %0, %cst [1] : vector<8x48xf32> to vector<8xf32>
    %5 = vector.shape_cast %4 : vector<8xf32> to vector<8x1xf32>
    %cst_7 = arith.constant 4.800000e+01 : f32
    %6 = vector.broadcast %cst_7 : f32 to vector<8x1xf32>
    %7 = arith.divf %5, %6 : vector<8x1xf32>
    %8 = vector.broadcast %7 : vector<8x1xf32> to vector<8x48xf32>
    %9 = arith.subf %0, %8 : vector<8x48xf32>
    %10 = arith.mulf %9, %9 : vector<8x48xf32>
    %cst_8 = arith.constant dense<0.000000e+00> : vector<8xf32>
    %11 = vector.multi_reduction <add>, %10, %cst_8 [1] : vector<8x48xf32> to vector<8xf32>
    %12 = vector.shape_cast %11 : vector<8xf32> to vector<8x1xf32>
    %cst_9 = arith.constant 4.800000e+01 : f32
    %13 = vector.broadcast %cst_9 : f32 to vector<8x1xf32>
    %14 = arith.divf %12, %13 : vector<8x1xf32>
    %15 = vector.broadcast %7 : vector<8x1xf32> to vector<8x48xf32>
    %16 = arith.subf %0, %15 : vector<8x48xf32>
    %cst_10 = arith.constant 9.99999974E-6 : f32
    %17 = vector.broadcast %cst_10 : f32 to vector<8x1xf32>
    %18 = arith.addf %14, %17 : vector<8x1xf32>
    %19 = math.rsqrt %18 : vector<8x1xf32>
    %20 = vector.broadcast %19 : vector<8x1xf32> to vector<8x48xf32>
    %21 = arith.mulf %16, %20 : vector<8x48xf32>
    %22 = vector.broadcast %2 : vector<1x48xf32> to vector<8x48xf32>
    %23 = arith.mulf %21, %22 : vector<8x48xf32>
    %24 = vector.broadcast %3 : vector<1x48xf32> to vector<8x48xf32>
    %25 = arith.addf %23, %24 : vector<8x48xf32>
    %cst_11 = arith.constant dense<0.000000e+00> : vector<64xf32>
    %26 = vector.multi_reduction <add>, %1, %cst_11 [1] : vector<64x48xf32> to vector<64xf32>
    %27 = vector.shape_cast %26 : vector<64xf32> to vector<64x1xf32>
    %cst_12 = arith.constant 4.800000e+01 : f32
    %28 = vector.broadcast %cst_12 : f32 to vector<64x1xf32>
    %29 = arith.divf %27, %28 : vector<64x1xf32>
    %30 = vector.broadcast %29 : vector<64x1xf32> to vector<64x48xf32>
    %31 = arith.subf %1, %30 : vector<64x48xf32>
    %32 = arith.mulf %31, %31 : vector<64x48xf32>
    %cst_13 = arith.constant dense<0.000000e+00> : vector<64xf32>
    %33 = vector.multi_reduction <add>, %32, %cst_13 [1] : vector<64x48xf32> to vector<64xf32>
    %34 = vector.shape_cast %33 : vector<64xf32> to vector<64x1xf32>
    %cst_14 = arith.constant 4.800000e+01 : f32
    %35 = vector.broadcast %cst_14 : f32 to vector<64x1xf32>
    %36 = arith.divf %34, %35 : vector<64x1xf32>
    %37 = vector.broadcast %29 : vector<64x1xf32> to vector<64x48xf32>
    %38 = arith.subf %1, %37 : vector<64x48xf32>
    %cst_15 = arith.constant 9.99999974E-6 : f32
    %39 = vector.broadcast %cst_15 : f32 to vector<64x1xf32>
    %40 = arith.addf %36, %39 : vector<64x1xf32>
    %41 = math.rsqrt %40 : vector<64x1xf32>
    %42 = vector.broadcast %41 : vector<64x1xf32> to vector<64x48xf32>
    %43 = arith.mulf %38, %42 : vector<64x48xf32>
    %44 = vector.broadcast %2 : vector<1x48xf32> to vector<64x48xf32>
    %45 = arith.mulf %43, %44 : vector<64x48xf32>
    %46 = vector.broadcast %3 : vector<1x48xf32> to vector<64x48xf32>
    %47 = arith.addf %45, %46 : vector<64x48xf32>
    %c0_16 = arith.constant 0 : index
    %c0_17 = arith.constant 0 : index
    %48 = vector.load %arg6[%c0_16, %c0_17] : memref<48x48xf32, #tpu.memory_space<vmem>>, vector<48x48xf32>
    %c0_18 = arith.constant 0 : index
    %c0_19 = arith.constant 0 : index
    %49 = vector.load %arg7[%c0_18, %c0_19] : memref<48x48xf32, #tpu.memory_space<vmem>>, vector<48x48xf32>
    %c0_20 = arith.constant 0 : index
    %c0_21 = arith.constant 0 : index
    %50 = vector.load %arg8[%c0_20, %c0_21] : memref<48x48xf32, #tpu.memory_space<vmem>>, vector<48x48xf32>
    %c0_22 = arith.constant 0 : index
    %c0_23 = arith.constant 0 : index
    %51 = vector.load %arg10[%c0_22, %c0_23] : memref<1x48xf32, #tpu.memory_space<vmem>>, vector<1x48xf32>
    %c0_24 = arith.constant 0 : index
    %c0_25 = arith.constant 0 : index
    %52 = vector.load %arg11[%c0_24, %c0_25] : memref<1x48xf32, #tpu.memory_space<vmem>>, vector<1x48xf32>
    %c0_26 = arith.constant 0 : index
    %c0_27 = arith.constant 0 : index
    %53 = vector.load %arg12[%c0_26, %c0_27] : memref<1x48xf32, #tpu.memory_space<vmem>>, vector<1x48xf32>
    %cst_28 = arith.constant dense<0.000000e+00> : vector<8x48xf32>
    %54 = tpu.matmul %25, %48, %cst_28 {dimension_numbers = #tpu.dot_dimension_numbers<[1], [0], [0], [1], [0, 0, 1, 1], [], []>} : vector<8x48xf32>, vector<48x48xf32>, vector<8x48xf32> -> vector<8x48xf32>
    %55 = vector.broadcast %51 : vector<1x48xf32> to vector<8x48xf32>
    %56 = arith.addf %54, %55 : vector<8x48xf32>
    %cst_29 = arith.constant 2.500000e-01 : f32
    %57 = vector.broadcast %cst_29 : f32 to vector<8x48xf32>
    %58 = arith.mulf %56, %57 : vector<8x48xf32>
    %cst_30 = arith.constant dense<0.000000e+00> : vector<8x48xf32>
    %59 = tpu.matmul %25, %49, %cst_30 {dimension_numbers = #tpu.dot_dimension_numbers<[1], [0], [0], [1], [0, 0, 1, 1], [], []>} : vector<8x48xf32>, vector<48x48xf32>, vector<8x48xf32> -> vector<8x48xf32>
    %60 = vector.broadcast %52 : vector<1x48xf32> to vector<8x48xf32>
    %61 = arith.addf %59, %60 : vector<8x48xf32>
    %cst_31 = arith.constant dense<0.000000e+00> : vector<8x48xf32>
    %62 = tpu.matmul %25, %50, %cst_31 {dimension_numbers = #tpu.dot_dimension_numbers<[1], [0], [0], [1], [0, 0, 1, 1], [], []>} : vector<8x48xf32>, vector<48x48xf32>, vector<8x48xf32> -> vector<8x48xf32>
    %63 = vector.broadcast %53 : vector<1x48xf32> to vector<8x48xf32>
    %64 = arith.addf %62, %63 : vector<8x48xf32>
    %cst_32 = arith.constant dense<0.000000e+00> : vector<64x48xf32>
    %65 = tpu.matmul %47, %49, %cst_32 {dimension_numbers = #tpu.dot_dimension_numbers<[1], [0], [0], [1], [0, 0, 1, 1], [], []>} : vector<64x48xf32>, vector<48x48xf32>, vector<64x48xf32> -> vector<64x48xf32>
    %66 = vector.broadcast %52 : vector<1x48xf32> to vector<64x48xf32>
    %67 = arith.addf %65, %66 : vector<64x48xf32>
    %cst_33 = arith.constant dense<0.000000e+00> : vector<64x48xf32>
    %68 = tpu.matmul %47, %50, %cst_33 {dimension_numbers = #tpu.dot_dimension_numbers<[1], [0], [0], [1], [0, 0, 1, 1], [], []>} : vector<64x48xf32>, vector<48x48xf32>, vector<64x48xf32> -> vector<64x48xf32>
    %69 = vector.broadcast %53 : vector<1x48xf32> to vector<64x48xf32>
    %70 = arith.addf %68, %69 : vector<64x48xf32>
    %71 = vector.shape_cast %67 : vector<64x48xf32> to vector<8x8x48xf32>
    %72 = vector.shape_cast %70 : vector<64x48xf32> to vector<8x8x48xf32>
    %c0_34 = arith.constant 0 : index
    %c0_35 = arith.constant 0 : index
    %73 = vector.load %arg5[%c0_34, %c0_35] : memref<48x48xf32, #tpu.memory_space<vmem>>, vector<48x48xf32>
    %74 = arith.mulf %58, %61 : vector<8x48xf32>
    %cst_36 = arith.constant dense<0.000000e+00> : vector<8x48xf32>
    %75 = tpu.matmul %74, %73, %cst_36 {dimension_numbers = #tpu.dot_dimension_numbers<[1], [0], [0], [1], [0, 0, 1, 1], [], []>} : vector<8x48xf32>, vector<48x48xf32>, vector<8x48xf32> -> vector<8x48xf32>
    %76 = vector.shape_cast %58 : vector<8x48xf32> to vector<8x1x48xf32>
    %77 = vector.broadcast %76 : vector<8x1x48xf32> to vector<8x8x48xf32>
    %78 = arith.mulf %77, %71 : vector<8x8x48xf32>
    %79 = vector.shape_cast %78 : vector<8x8x48xf32> to vector<64x48xf32>
    %cst_37 = arith.constant dense<0.000000e+00> : vector<64x48xf32>
    %80 = tpu.matmul %79, %73, %cst_37 {dimension_numbers = #tpu.dot_dimension_numbers<[1], [0], [0], [1], [0, 0, 1, 1], [], []>} : vector<64x48xf32>, vector<48x48xf32>, vector<64x48xf32> -> vector<64x48xf32>
    %81 = vector.shape_cast %80 : vector<64x48xf32> to vector<8x8x48xf32>
    %cst_38 = arith.constant dense<0xFF800000> : vector<8x48xf32>
    %82 = vector.multi_reduction <maximumf>, %81, %cst_38 [1] : vector<8x8x48xf32> to vector<8x48xf32>
    %83 = arith.maximumf %75, %82 : vector<8x48xf32>
    %84 = arith.subf %75, %83 : vector<8x48xf32>
    %85 = math.exp %84 : vector<8x48xf32>
    %86 = vector.shape_cast %83 : vector<8x48xf32> to vector<8x1x48xf32>
    %87 = vector.broadcast %86 : vector<8x1x48xf32> to vector<8x8x48xf32>
    %88 = arith.subf %81, %87 : vector<8x8x48xf32>
    %89 = math.exp %88 : vector<8x8x48xf32>
    %cst_39 = arith.constant dense<0.000000e+00> : vector<8x48xf32>
    %90 = vector.multi_reduction <add>, %89, %cst_39 [1] : vector<8x8x48xf32> to vector<8x48xf32>
    %91 = arith.addf %85, %90 : vector<8x48xf32>
    %92 = tpu.reciprocal %91 : vector<8x48xf32> -> vector<8x48xf32>
    %93 = arith.mulf %85, %64 : vector<8x48xf32>
    %94 = arith.mulf %89, %72 : vector<8x8x48xf32>
    %cst_40 = arith.constant dense<0.000000e+00> : vector<8x48xf32>
    %95 = vector.multi_reduction <add>, %94, %cst_40 [1] : vector<8x8x48xf32> to vector<8x48xf32>
    %96 = arith.addf %93, %95 : vector<8x48xf32>
    %97 = arith.mulf %96, %92 : vector<8x48xf32>
    %c0_41 = arith.constant 0 : index
    %c0_42 = arith.constant 0 : index
    %98 = vector.load %arg9[%c0_41, %c0_42] : memref<48x48xf32, #tpu.memory_space<vmem>>, vector<48x48xf32>
    %cst_43 = arith.constant dense<0.000000e+00> : vector<8x48xf32>
    %99 = tpu.matmul %97, %98, %cst_43 {dimension_numbers = #tpu.dot_dimension_numbers<[1], [0], [0], [1], [0, 0, 1, 1], [], []>} : vector<8x48xf32>, vector<48x48xf32>, vector<8x48xf32> -> vector<8x48xf32>
    %c0_44 = arith.constant 0 : index
    %c0_45 = arith.constant 0 : index
    %100 = vector.load %arg13[%c0_44, %c0_45] : memref<1x48xf32, #tpu.memory_space<vmem>>, vector<1x48xf32>
    %101 = vector.broadcast %100 : vector<1x48xf32> to vector<8x48xf32>
    %102 = arith.addf %99, %101 : vector<8x48xf32>
    %103 = arith.addf %0, %102 : vector<8x48xf32>
    %c0_46 = arith.constant 0 : index
    %c0_47 = arith.constant 0 : index
    %104 = vector.load %arg14[%c0_46, %c0_47] : memref<8x48xf32, #tpu.memory_space<vmem>>, vector<8x48xf32>
    tpu.vector_store %arg14[%c0_46, %c0_47], %103 {strides = array<i32>} : memref<8x48xf32, #tpu.memory_space<vmem>>, vector<8x48xf32>,
    return
  }
  func.func @transform_0(%arg0: i32) -> (i32, i32) {
    %c0_i32 = arith.constant 0 : i32
    %c0_i32_0 = arith.constant 0 : i32
    return %arg0, %c0_i32 : i32, i32
  }
  func.func @transform_1(%arg0: i32) -> (i32, i32) {
    %c0_i32 = arith.constant 0 : i32
    %c0_i32_0 = arith.constant 0 : i32
    return %arg0, %c0_i32 : i32, i32
  }
  func.func @transform_2(%arg0: i32) -> (i32, i32) {
    %c0_i32 = arith.constant 0 : i32
    %c0_i32_0 = arith.constant 0 : i32
    %c0_i32_1 = arith.constant 0 : i32
    return %c0_i32, %c0_i32_0 : i32, i32
  }
  func.func @transform_3(%arg0: i32) -> (i32, i32) {
    %c0_i32 = arith.constant 0 : i32
    %c0_i32_0 = arith.constant 0 : i32
    %c0_i32_1 = arith.constant 0 : i32
    return %c0_i32, %c0_i32_0 : i32, i32
  }
  func.func @transform_4(%arg0: i32) -> (i32, i32) {
    %c0_i32 = arith.constant 0 : i32
    %c0_i32_0 = arith.constant 0 : i32
    %c0_i32_1 = arith.constant 0 : i32
    return %c0_i32, %c0_i32_0 : i32, i32
  }
  func.func @transform_5(%arg0: i32) -> (i32, i32) {
    %c0_i32 = arith.constant 0 : i32
    %c0_i32_0 = arith.constant 0 : i32
    %c0_i32_1 = arith.constant 0 : i32
    return %c0_i32, %c0_i32_0 : i32, i32
  }
  func.func @transform_6(%arg0: i32) -> (i32, i32) {
    %c0_i32 = arith.constant 0 : i32
    %c0_i32_0 = arith.constant 0 : i32
    %c0_i32_1 = arith.constant 0 : i32
    return %c0_i32, %c0_i32_0 : i32, i32
  }
  func.func @transform_7(%arg0: i32) -> (i32, i32) {
    %c0_i32 = arith.constant 0 : i32
    %c0_i32_0 = arith.constant 0 : i32
    %c0_i32_1 = arith.constant 0 : i32
    return %c0_i32, %c0_i32_0 : i32, i32
  }
  func.func @transform_8(%arg0: i32) -> (i32, i32) {
    %c0_i32 = arith.constant 0 : i32
    %c0_i32_0 = arith.constant 0 : i32
    %c0_i32_1 = arith.constant 0 : i32
    return %c0_i32, %c0_i32_0 : i32, i32
  }
  func.func @transform_9(%arg0: i32) -> (i32, i32) {
    %c0_i32 = arith.constant 0 : i32
    %c0_i32_0 = arith.constant 0 : i32
    %c0_i32_1 = arith.constant 0 : i32
    return %c0_i32, %c0_i32_0 : i32, i32
  }
  func.func @transform_10(%arg0: i32) -> (i32, i32) {
    %c0_i32 = arith.constant 0 : i32
    %c0_i32_0 = arith.constant 0 : i32
    %c0_i32_1 = arith.constant 0 : i32
    return %c0_i32, %c0_i32_0 : i32, i32
  }
  func.func @transform_11(%arg0: i32) -> (i32, i32) {
    %c0_i32 = arith.constant 0 : i32
    %c0_i32_0 = arith.constant 0 : i32
    %c0_i32_1 = arith.constant 0 : i32
    return %c0_i32, %c0_i32_0 : i32, i32
  }
  func.func @transform_12(%arg0: i32) -> (i32, i32) {
    %c0_i32 = arith.constant 0 : i32
    %c0_i32_0 = arith.constant 0 : i32
    %c0_i32_1 = arith.constant 0 : i32
    return %c0_i32, %c0_i32_0 : i32, i32
  }
  func.func @transform_13(%arg0: i32) -> (i32, i32) {
    %c0_i32 = arith.constant 0 : i32
    %c0_i32_0 = arith.constant 0 : i32
    return %arg0, %c0_i32 : i32, i32
  }
}

</mosaic_0001>

<bundles_post_ra>
// kernel: tpu_custom_call.1
= control target key start
LH: loop header
LB: loop body
LE: loop exit
PB: predicated region body
PF: predicated region fallthrough
CT: control target
= control target key end

     0   :  { %s3290_s0 = inlined_call_operand.hbm [shape: f32[16,48], index: 0, kind: input, shape index: {}]   ;;  %s3291_s1 = inlined_call_operand.vmem [shape: f32[128,48], index: 1, kind: input, shape index: {}]   ;;  %s3292_s2 = inlined_call_operand.vmem [shape: f32[1,48], index: 2, kind: input, shape index: {}]   ;;  %s3293_s3 = inlined_call_operand.vmem [shape: f32[1,48], index: 3, kind: input, shape index: {}]   ;;  %s3294_s4 = inlined_call_operand.vmem [shape: f32[48,48], index: 4, kind: input, shape index: {}]   ;;  %s3295_s5 = inlined_call_operand.vmem [shape: f32[48,48], index: 5, kind: input, shape index: {}]   ;;  %s3296_s6 = inlined_call_operand.vmem [shape: f32[48,48], index: 6, kind: input, shape index: {}]   ;;  %s3297_s7 = inlined_call_operand.vmem [shape: f32[48,48], index: 7, kind: input, shape index: {}]   ;;  %s3298_s8 = inlined_call_operand.hbm [shape: f32[48,48], index: 8, kind: input, shape index: {}]   ;;  %s3299_s9 = inlined_call_operand.vmem [shape: f32[1,48], index: 9, kind: input, shape index: {}]   ;;  %s3300_s10 = inlined_call_operand.vmem [shape: f32[1,48], index: 10, kind: input, shape index: {}]   ;;  %s3301_s11 = inlined_call_operand.vmem [shape: f32[1,48], index: 11, kind: input, shape index: {}]   ;;  %s3302_s12 = inlined_call_operand.vmem [shape: f32[1,48], index: 12, kind: input, shape index: {}]   ;;  %s3303_s13 = inlined_call_operand.hbm [shape: f32[16,48], index: 13, kind: output, shape index: {}]  }
   0x1   :  { %3312 = sst [smem:[#allocation14_spill]] %s3301_s11 }
   0x2   :  { %3313 = sst [smem:[#allocation15_spill]] %s3302_s12 }
   0x3   :  { %3314 = sst [smem:[#allocation16_spill]] %s3303_s13 }
   0x4   :  { %18 = vsyncpa [#allocation3], 0 }
   0x5   :  { %20 = vsyncpa [#allocation3 + $0x1], 0 }
   0x6   :  { %21 = vsyncpa [#allocation6], 0 }
   0x7   :  { %22 = vsyncpa [#allocation4], 0 }
   0x8   :  { %24 = vsyncpa [#allocation4 + $0x1], 0  ;;  %s2662_s25 = smov 0   ;;  %s2664_s26 = smov 0  }
   0x9   :  { %s2666_s27 = smov 0   ;;  %s2668_s28 = smov 0  }
   0xa LB: > { %3315 = sst [smem:[#allocation11_spill]] %s2569_s25  ;;  %s2683_s29 = sadd.s32 4294967295, %s2581_s28   ;;  %s2581_s28 = sphi %s2668_s28, %s3336_s28   ;;  %s2577_s27 = sphi %s2666_s27, %s3339_s27   ;;  %s2573_s26 = sphi %s2664_s26, %s3338_s26   ;;  %s2569_s25 = sphi %s2662_s25, %s3337_s25  }
   0xb   : > { %s1995_s30 = sadd.s32 4294967294, %s2581_s28   ;;  %p50_p0 = scmp.ne.s32.totalorder %s2573_s26, %s2569_s25 }
   0xc   : > { %p3309_p1 = scmp.eq.s32.totalorder %s2683_s29, 0  ;;  %p337_p3 = scmp.eq.s32.totalorder %s1995_s30, 1 }
   0xd   : > { %p1996_p5 = scmp.ge.s32.totalorder %s2581_s28, 1  ;;  %p344_p7 = scmp.lt.s32.totalorder %s2581_s28, 3 }
   0xe   : > { %p2692_p4 = por %p3309_p1, %p50_p0  ;;  %p2697_p6 = por %p337_p3, %p50_p0 }
   0xf   : > { %p2702_p8 = pnand %p1996_p5, %p344_p7  ;;  %s2583_s17 = smov [#allocation5]  }
  0x10   : > { %s3316_s14 = scalar_select %p2692_p4, 1, 0 }
  0x11   : > { %s3317_s15 = scalar_select %p2697_p6, 1, 0 }
  0x12   : > { %s3319_s16 = scalar_select %p2702_p8, 1, 0 }
  0x13   : > { %3318 = sst [smem:[#allocation12_spill]] %s3317_s15  ;;  %s374_s18 = sshll.u32 %s2583_s17, 4  ;;  %s2706_s18 = int_to_ptr.vmem [resolvable:$true] %s374_s18 }
  0x14   : > { %p2359_p9 = pneg %p2702_p8  ;;  %s2718_s20 = sadd.s32 1, %s2581_s28  }
  0x15   : > { %3321 = sst [smem:[#allocation13_spill]] %s2718_s20  ;;  %s37_s21 = sadd.s32 1, %s2577_s27 }
  0x16   : > { %p2713_p11 = pnand %p2359_p9, %p3309_p1  ;;  %s34_s22 = ssub.s32 %s2581_s28, %s2718_s20 }
  0x17   : > { %s2453_s30 = scalar_lea.hbm %s3298_s8, 768 }
  0x18   : > { %p2454_p12 = scmp.ne.s32.totalorder %s3298_s8, %s2453_s30  ;;  %p2455_p13 = pneg %p2713_p11 }
  0x19   : > { %p2460_p5 = scmp.lt.u32.totalorder %s2453_s30, %s3298_s8 }
  0x1a   : > { %p2456_p0 = pnand %p2455_p13, %p2454_p12 }
  0x1c   : > { %p2457_p3 = pneg %p2456_p0 }
  0x1e   : > { %p2462_p7 = pnand %p2460_p5, %p2457_p3 }
  0x20   : > { %2465 = shalt.err (!%p2462_p7)
}
  0x21   : > { %s2466_s20 = scalar_lea.vmem %s2706_s18, 768  ;;  %p2474_p2 = scmp.lt.s32.totalorder %s2706_s18, %s2706_s18 }
  0x22   : > { %p2467_p9 = scmp.ne.s32.totalorder %s2706_s18, %s2466_s20  ;;  %p2475_p6 = scmp.lt.s32.totalorder %s2466_s20, %s2466_s20 }
  0x24   : > { %p2469_p10 = pnand %p2467_p9, %p2455_p13  ;;  %p2476_p4 = por %p2475_p6, %p2474_p2 }
  0x26   : > { %p2470_p1 = pneg %p2469_p10 }
  0x28   : > { %p2477_p8 = pnand %p2476_p4, %p2470_p1 }
  0x2a   : > { %2480 = shalt.err (!%p2477_p8)
}
  0x2b   : > { %s2584_s15 = smov 128   ;;  %s2585_s13 = smov 8  }
  0x2c   : > { %2362 = dma.hbm_to_vmem [thread:$0]  (!%p2713_p11), %s3298_s8, 768, %s2706_s18, [#allocation6], %s2584_s15, %s2584_s15, %s2585_s13  }
  0x2d   : > { %p35_p2 = scmp.eq.s32.totalorder %s34_s22, 0  ;;  %p44_p1 = scmp.ne.s32.totalorder %s2577_s27, %s2573_s26 }
  0x2e   : > { %p45_p4 = scmp.eq.s32.totalorder %s2581_s28, 0  ;;  %p2372_p6 = scmp.lt.s32.totalorder %s2581_s28, 2 }
  0x2f   : > { %s2749_s20 = scalar_select %p35_p2, %s2577_s27, %s37_s21  }
  0x30   : > { %p46_p8 = por %p45_p4, %p44_p1  ;;  %p3322_p10 = scmp.eq.s32.totalorder %s2683_s29, 1 }
  0x31   : > { %s400_s30 = sand.u32 1, %s2577_s27   ;;  %s2000_s17 = sshll.u32 %s2581_s28, 7 }
  0x32   : > { %p2753_p12 = por %p3322_p10, %p44_p1  ;;  %s1999_s12 = sshll.u32 %s400_s30, 3 }
  0x33   : > { %s2762_s25 = scalar_lea.hbm %s3290_s0, %s2000_s17  ;;  %s404_s18 = scalar_lea.vmem [#allocation2], %s1999_s12 }
  0x34   : > { %s411_s21 = sshll.u32 %s404_s18, 4  ;;  %p2764_p11 = pnand %p2372_p6, %p46_p8  ;;  %s2768_s21 = int_to_ptr.vmem [resolvable:$true] %s411_s21 }
  0x35   : > { %s401_s15 = scalar_lea.sflag [#allocation3], %s400_s30  ;;  %s2481_s13 = scalar_lea.hbm %s2762_s25, 128 }
  0x36   : > { %p2482_p13 = scmp.ne.s32.totalorder %s2762_s25, %s2481_s13  ;;  %p2483_p0 = pneg %p2764_p11 }
  0x37   : > { %s2486_s23 = scalar_lea.hbm %s3290_s0, 256  ;;  %p2487_p7 = scmp.lt.u32.totalorder %s2762_s25, %s3290_s0 }
  0x38   : > { %p2484_p3 = pnand %p2483_p0, %p2482_p13  ;;  %p2488_p9 = scmp.lt.u32.totalorder %s2486_s23, %s2481_s13 }
  0x39   : > { %p2490_p1 = scmp.lt.u32.totalorder %s2481_s13, %s2762_s25 }
  0x3a   : > { %p2485_p5 = pneg %p2484_p3  ;;  %p2489_p2 = por %p2488_p9, %p2487_p7 }
  0x3c   : > { %p2491_p4 = por %p2490_p1, %p2489_p2 }
  0x3e   : > { %p2492_p6 = pnand %p2491_p4, %p2485_p5 }
  0x40   : > { %2495 = shalt.err (!%p2492_p6)
}
  0x41   : > { %s2496_s30 = scalar_lea.vmem %s2768_s21, 128  ;;  %s2586_s18 = smov [#allocation2]  }
  0x42   : > { %p2497_p8 = scmp.ne.s32.totalorder %s2768_s21, %s2496_s30  ;;  %s2501_s11 = sshll.u32 %s2586_s18, 4  ;;  %s2502_s11 = int_to_ptr.vmem [resolvable:$false] %s2501_s11 }
  0x43   : > { %s2503_s12 = scalar_lea.vmem %s2502_s11, 256  ;;  %p2504_p3 = scmp.lt.s32.totalorder %s2768_s21, %s2502_s11 }
  0x44   : > { %p2499_p10 = pnand %p2497_p8, %p2483_p0  ;;  %p2505_p7 = scmp.lt.s32.totalorder %s2503_s12, %s2496_s30 }
  0x46   : > { %p2500_p13 = pneg %p2499_p10  ;;  %p2506_p9 = por %p2505_p7, %p2504_p3 }
  0x48   : > { %p2507_p2 = pnand %p2506_p9, %p2500_p13 }
  0x4a   : > { %2510 = shalt.err (!%p2507_p2)
}
  0x4b   : > { %2366 = dma.hbm_to_vmem [thread:$0]  (!%p2764_p11), %s2762_s25, 128, %s2768_s21, %s401_s15  }
  0x4c   : > { %p3325_p5 = scmp.ne.s32.totalorder %s3319_s16, 0 }
  0x4d   : > { %s2798_s13 = sand.u32 (!%p3325_p5), 1, %s2573_s26   ;;  %p3326_p0 = scmp.ne.s32.totalorder (!%p3325_p5), %s3316_s14, 0 }
  0x4e   : > { %429 = sbr.rel (%p3325_p5) target bundleno = 1174 (0x496), region = 72  ;;  %s2002_s23 = sshll.u32 (!%p3325_p5), %s2798_s13, 3 }
  0x4f   : > { %s432_s17 = scalar_lea.sflag (!%p3325_p5), [#allocation3], %s2798_s13  ;;  %s2804_s19 = scalar_lea.vmem (!%p3325_p5), [#allocation2], %s2002_s23 }
  0x55   : > { %2556 = dma.done.wait (%p3326_p0), %s432_s17, 128  }
  0x56   : > { %2558 = vsyncadd (%p3326_p0), %s432_s17, 4294967168  ;;  %p3327_p11 = scmp.eq.s32.totalorder %s2683_s29, 0 }
  0x58   : > { %2560 = dma.done.wait (%p3327_p11), [#allocation6], 768   ;;  %p3328_p1 = pmov %p3327_p11 }
  0x59   : > { %s2005_s16 = sshll.u32 %s2683_s29, 3  ;;  %vm504_vm0 = vcmask 392192   ;;  %v493_v0 = vld [vmem:[%s2804_s19] sm:$0xff]  ;;  %vm2588_vm1 = vmmov 0   ;;  %vm1511_vm2 = vcmask 1041409   ;;  %vm1513_vm3 = vcmask 1042434  }
  0x5a   : > { %2562 = vsyncadd (%p3328_p1), [#allocation6], 4294966528  ;;  %p488_p4 = scmp.lt.s32.totalorder %s2005_s16, 15  ;;  %v505_v3 = vsel %vm504_vm0, %v493_v0, 0.0  ;;  %v653_v63 = vld [vmem:[%s3295_s5] sm:$0xff]  ;;  %vm1515_vm4 = vcmask 1043459  }
  0x5b   : > { %506 = vadd.xlane.f32.xlu0 %v505_v3  ;;  %v660_v3 = vld [vmem:[%s3296_s6 + $0x8] sm:$0xff]  ;;  %vm1517_vm5 = vcmask 1044484   ;;  %vm1519_vm6 = vcmask 1045509   ;;  %vm1521_vm7 = vcmask 1046534   ;;  %vm1523_vm8 = vcmask 1047559   ;;  %s3329_s11 = sld [smem:[#allocation14_spill]] }
  0x5c   : > { %s3341_s16 = smov (!%p488_p4, %s2005_s16), 15  ;;  %s486_s21 = scalar_lea.vmem [#allocation7], %s2002_s23 }
  0x5d   : > { %s2006_s25 = sshll.u32 %s3341_s16, 3  ;;  %s3330_s16 = sld [smem:[#allocation15_spill]] }
  0x5e   : > { %s491_s15 = scalar_lea.vmem %s3291_s1, %s2006_s25  ;;  %s2043_s25 = sshll.u32 %s2683_s29, 7 }
  0x5f   : > { %v495_v1 = vld [vmem:[%s491_s15 + $0x8] sm:$0xff]  ;;  %v494_v2 = vld [vmem:[%s491_s15] sm:$0xff]  ;;  %v496_v5 = vld [vmem:[%s491_s15 + $0x10] sm:$0xff]  ;;  %s1903_s22 = sshll.u32 %s486_s21, 4  ;;  %s3331_s30 = sld [smem:[#allocation16_spill]]  ;;  %s3247_s22 = int_to_ptr.vmem [resolvable:$true] %s1903_s22 }
  0x60   : > { %v536_v4 = vsel %vm504_vm0, %v495_v1, 0.0  ;;  %v533_v6 = vsel %vm504_vm0, %v494_v2, 0.0  ;;  %v539_v7 = vsel %vm504_vm0, %v496_v5, 0.0  ;;  %v497_v8 = vld [vmem:[%s491_s15 + $0x18] sm:$0xff]  ;;  %v498_v9 = vld [vmem:[%s491_s15 + $0x20] sm:$0xff]  ;;  %v499_v12 = vld [vmem:[%s491_s15 + $0x28] sm:$0xff] }
  0x61   : > { %537 = vadd.xlane.f32.xlu1 %v536_v4  ;;  %534 = vadd.xlane.f32.xlu0 %v533_v6  ;;  %v542_v10 = vsel %vm504_vm0, %v497_v8, 0.0  ;;  %v545_v11 = vsel %vm504_vm0, %v498_v9, 0.0  ;;  %v500_v13 = vld [vmem:[%s491_s15 + $0x30] sm:$0xff]  ;;  %v548_v14 = vsel %vm504_vm0, %v499_v12, 0.0  ;;  %v501_v16 = vld [vmem:[%s491_s15 + $0x38] sm:$0xff]  ;;  %v2587_v4 = vmov 0.0|0.0  }
  0x62   : > { %v551_v15 = vsel %vm504_vm0, %v500_v13, 0.0  ;;  %v554_v17 = vsel %vm504_vm0, %v501_v16, 0.0  ;;  %2270 = vmatprep.subr.bf16.mxu0 %v2587_v4  ;;  %2279 = vmatprep.subr.bf16.mxu1 %v2587_v4  ;;  %v655_v6 = vld [vmem:[%s3295_s5 + $0x10] sm:$0xff]  ;;  %s1890_s29 = scalar_lea.sflag [#allocation4], %s2798_s13  ;;  %s2591_s23 = smov [#allocation7]  }
  0x65   : > { %540 = vadd.xlane.f32.xlu1 %v539_v7  ;;  %543 = vadd.xlane.f32.xlu0 %v542_v10  ;;  %v656_v7 = vld [vmem:[%s3295_s5 + $0x18] sm:$0xff]  ;;  %s3245_s18 = scalar_lea.hbm %s3331_s30, %s2043_s25 }
  0x66   : > { %v662_v10 = vld [vmem:[%s3296_s6 + $0x18] sm:$0xff] }
  0x69   : > { %546 = vadd.xlane.f32.xlu1 %v545_v11  ;;  %549 = vadd.xlane.f32.xlu0 %v548_v14  ;;  %v663_v14 = vld [vmem:[%s3296_s6 + $0x20] sm:$0xff] }
  0x6d   : > { %552 = vadd.xlane.f32.xlu1 %v551_v15  ;;  %555 = vadd.xlane.f32.xlu0 %v554_v17 }
  0xe8   : > { %v507_v18 = vpop.xlane.xlu0 %506 }
  0xe9   : > { %v509_v20 = vmul.f32 0.020833334, %v507_v18  ;;  %v2589_v18 = vmov 0.0  }
  0xea   : > { %2135 = vmatprep.mubr.msk.f32.mxu0 %vm2588_vm1, %v2589_v18  ;;  %2150 = vmatprep.mubr.msk.f32.mxu1 %vm2588_vm1, %v2589_v18 }
  0xeb   : > { %v2828_v22 = vsub.f32 %v493_v0, %v509_v20  ;;  %v654_v0 = vld [vmem:[%s3295_s5 + $0x8] sm:$0xff] }
  0xed   : > { %v511_v28 = vmul.f32 %v2828_v22, %v2828_v22 }
  0xee   : > { %v538_v19 = vpop.xlane.xlu1 %537  ;;  %v535_v24 = vpop.xlane.xlu0 %534 }
  0xef   : > { %v558_v21 = vmul.f32 0.020833334, %v538_v19  ;;  %v557_v26 = vmul.f32 0.020833334, %v535_v24  ;;  %v512_v32 = vsel %vm504_vm0, %v511_v28, 0.0 }
  0xf0   : > { %513 = vadd.xlane.f32.xlu1 %v512_v32 }
  0xf1   : > { %v2830_v23 = vsub.f32 %v495_v1, %v558_v21  ;;  %v2836_v30 = vsub.f32 %v494_v2, %v557_v26  ;;  %v659_v1 = vld [vmem:[%s3296_s6] sm:$0xff]  ;;  %v2271_v2 = vpack.c.bf16 %v654_v0, %v653_v63  ;;  %v667_v0 = vld [vmem:[%s3297_s7 + $0x10] sm:$0xff] }
  0xf2   : > { %v541_v25 = vpop.xlane.xlu1 %540  ;;  %v544_v33 = vpop.xlane.xlu0 %543 }
  0xf3   : > { %v559_v27 = vmul.f32 0.020833334, %v541_v25  ;;  %v574_v29 = vmul.f32 %v2830_v23, %v2830_v23  ;;  %v560_v36 = vmul.f32 0.020833334, %v544_v33  ;;  %v573_v38 = vmul.f32 %v2836_v30, %v2836_v30  ;;  %2272 = vmatpush3.bf16.msra.mxu0 %v2271_v2 }
  0xf4   : > { %2273 = vmatprep.subr.bf16.mxu0 %v2587_v4 }
  0xf5   : > { %v2838_v31 = vsub.f32 %v496_v5, %v559_v27  ;;  %v584_v35 = vsel %vm504_vm0, %v574_v29, 0.0  ;;  %v2846_v40 = vsub.f32 %v497_v8, %v560_v36  ;;  %v581_v42 = vsel %vm504_vm0, %v573_v38, 0.0  ;;  %v661_v8 = vld [vmem:[%s3296_s6 + $0x10] sm:$0xff] }
  0xf6   : > { %v547_v34 = vpop.xlane.xlu1 %546  ;;  %585 = vadd.xlane.f32.xlu1 %v584_v35  ;;  %582 = vadd.xlane.f32.xlu0 %v581_v42  ;;  %v550_v43 = vpop.xlane.xlu0 %549  ;;  %v2887_v5 = vpack.c.bf16 %v660_v3, %v659_v1  ;;  %v2904_v11 = vpack.c.bf16 %v662_v10, %v661_v8  ;;  %v668_v1 = vld [vmem:[%s3297_s7 + $0x18] sm:$0xff]  ;;  %v670_v10 = vld [vmem:[%s3297_s7 + $0x28] sm:$0xff] }
  0xf7   : > { %v561_v37 = vmul.f32 0.020833334, %v547_v34  ;;  %v575_v39 = vmul.f32 %v2838_v31, %v2838_v31  ;;  %v562_v46 = vmul.f32 0.020833334, %v550_v43  ;;  %v576_v48 = vmul.f32 %v2846_v40, %v2846_v40 }
  0xf8   : > { %2281 = vmatpush3.bf16.msra.mxu1 %v2887_v5 }
  0xf9   : > { %v2848_v41 = vsub.f32 %v498_v9, %v561_v37  ;;  %v587_v45 = vsel %vm504_vm0, %v575_v39, 0.0  ;;  %v2856_v50 = vsub.f32 %v499_v12, %v562_v46  ;;  %v590_v52 = vsel %vm504_vm0, %v576_v48, 0.0  ;;  %2282 = vmatprep.subr.bf16.mxu1 %v2587_v4  ;;  %v657_v12 = vld [vmem:[%s3295_s5 + $0x20] sm:$0xff] }
  0xfa   : > { %v553_v44 = vpop.xlane.xlu1 %552  ;;  %588 = vadd.xlane.f32.xlu0 %v587_v45  ;;  %591 = vadd.xlane.f32.xlu1 %v590_v52  ;;  %v556_v53 = vpop.xlane.xlu0 %555  ;;  %v2274_v9 = vpack.c.bf16 %v656_v7, %v655_v6  ;;  %v2292_v6 = vpack.c.bf16 %v668_v1, %v667_v0 }
  0xfb   : > { %v563_v47 = vmul.f32 0.020833334, %v553_v44  ;;  %v577_v49 = vmul.f32 %v2848_v41, %v2848_v41  ;;  %v564_v54 = vmul.f32 0.020833334, %v556_v53  ;;  %v578_v56 = vmul.f32 %v2856_v50, %v2856_v50  ;;  %v665_v53 = vld [vmem:[%s3297_s7] sm:$0xff] }
  0xfc   : > { %2275 = vmatpush3.bf16.msra.mxu0 %v2274_v9  ;;  %2284 = vmatpush3.bf16.msra.mxu1 %v2904_v11 }
  0xfd   : > { %v2858_v51 = vsub.f32 %v500_v13, %v563_v47  ;;  %v593_v55 = vsel %vm504_vm0, %v577_v49, 0.0  ;;  %v2866_v58 = vsub.f32 %v501_v16, %v564_v54  ;;  %v596_v59 = vsel %vm504_vm0, %v578_v56, 0.0  ;;  %2276 = vmatprep.subr.bf16.mxu0 %v2587_v4  ;;  %v658_v13 = vld [vmem:[%s3295_s5 + $0x28] sm:$0xff]  ;;  %2285 = vmatprep.subr.bf16.mxu1 %v2587_v4  ;;  %v2933_v47 = vld [vmem:[%s3292_s2] ss:$0 sm:$0xff] }
  0xfe   : > { %594 = vadd.xlane.f32.xlu0 %v593_v55  ;;  %597 = vadd.xlane.f32.xlu1 %v596_v59  ;;  %v2277_v15 = vpack.c.bf16 %v658_v13, %v657_v12  ;;  %v664_v16 = vld [vmem:[%s3296_s6 + $0x28] sm:$0xff] }
  0xff   : > { %v579_v57 = vmul.f32 %v2858_v51, %v2858_v51  ;;  %v580_v61 = vmul.f32 %v2866_v58, %v2866_v58  ;;  %v2921_v17 = vpack.c.bf16 %v664_v16, %v663_v14  ;;  %v666_v54 = vld [vmem:[%s3297_s7 + $0x8] sm:$0xff] }
 0x100   : > { %2278 = vmatpush3.bf16.msra.mxu0 %v2277_v15 }
 0x101   : > { %v599_v60 = vsel %vm504_vm0, %v579_v57, 0.0  ;;  %v602_v62 = vsel %vm504_vm0, %v580_v61, 0.0  ;;  %2287 = vmatpush3.bf16.msra.mxu1 %v2921_v17  ;;  %2288 = vmatprep.subr.bf16.mxu0 %v2587_v4  ;;  %v2945_v57 = vld [vmem:[%s3293_s3] ss:$0 sm:$0xff]  ;;  %v2289_v61 = vpack.c.bf16 %v666_v54, %v665_v53 }
 0x102   : > { %600 = vadd.xlane.f32.xlu0 %v599_v60  ;;  %603 = vadd.xlane.f32.xlu1 %v602_v62  ;;  %v2009_v53 = vld [vmem:[%s3299_s9] ss:$0 sm:$0xff] }
 0x103   : > { %2298 = vmatprep.subr.bf16.mxu1 %v2887_v5 }
 0x17d   : > { %v514_v19 = vpop.xlane.xlu1 %513 }
 0x17e   : > { %v515_v20 = vmul.f32 0.020833334, %v514_v19 }
 0x180   : > { %v516_v21 = vadd.f32 1e-05, %v515_v20 }
 0x182   : > { %2414 = vrsqrt.f32 %v516_v21  ;;  %v1141_v21 = vld [vmem:[%s3294_s4 + $0x8] sm:$0xff] }
 0x183   : > { %v586_v24 = vpop.xlane.xlu1 %585  ;;  %v583_v25 = vpop.xlane.xlu0 %582 }
 0x184   : > { %v606_v26 = vmul.f32 0.020833334, %v586_v24  ;;  %v605_v27 = vmul.f32 0.020833334, %v583_v25 }
 0x186   : > { %v614_v28 = vadd.f32 1e-05, %v606_v26  ;;  %v613_v29 = vadd.f32 1e-05, %v605_v27 }
 0x187   : > { %v592_v32 = vpop.xlane.xlu1 %591  ;;  %v589_v33 = vpop.xlane.xlu0 %588 }
 0x188   : > { %v608_v34 = vmul.f32 0.020833334, %v592_v32  ;;  %v607_v35 = vmul.f32 0.020833334, %v589_v33  ;;  %2416 = vrsqrt.f32 %v613_v29 }
 0x189   : > { %2418 = vrsqrt.f32 %v614_v28 }
 0x18a   : > { %v616_v36 = vadd.f32 1e-05, %v608_v34  ;;  %v615_v37 = vadd.f32 1e-05, %v607_v35 }
 0x18b   : > { %v598_v38 = vpop.xlane.xlu1 %597  ;;  %v595_v39 = vpop.xlane.xlu0 %594 }
 0x18c   : > { %v610_v42 = vmul.f32 0.020833334, %v598_v38  ;;  %v609_v43 = vmul.f32 0.020833334, %v595_v39  ;;  %2420 = vrsqrt.f32 %v615_v37  ;;  %v2415_v44 = vpop.eup %2414  ;;  %v1142_v38 = vld [vmem:[%s3294_s4 + $0x10] sm:$0xff]  ;;  %v1143_v39 = vld [vmem:[%s3294_s4 + $0x18] sm:$0xff] }
 0x18d   : > { %2422 = vrsqrt.f32 %v616_v36  ;;  %v518_v52 = vmul.f32 %v2415_v44, %v2828_v22  ;;  %v1145_v44 = vld [vmem:[%s3294_s4 + $0x28] sm:$0xff] }
 0x18e   : > { %v618_v45 = vadd.f32 1e-05, %v610_v42  ;;  %v617_v46 = vadd.f32 1e-05, %v609_v43  ;;  %v2325_v42 = vpack.c.bf16 %v1143_v39, %v1142_v38  ;;  %v1144_v43 = vld [vmem:[%s3294_s4 + $0x20] sm:$0xff] }
 0x18f   : > { %v604_v48 = vpop.xlane.xlu1 %603  ;;  %v601_v49 = vpop.xlane.xlu0 %600  ;;  %v525_v59 = vmul.f32 %v2933_v47, %v518_v52 }
 0x190   : > { %v612_v55 = vmul.f32 0.020833334, %v604_v48  ;;  %v611_v56 = vmul.f32 0.020833334, %v601_v49  ;;  %2424 = vrsqrt.f32 %v617_v46  ;;  %v2590_v46 = vmov 1966171168  }
 0x191   : > { %2426 = vrsqrt.f32 %v618_v45  ;;  %v532_v63 = vadd.f32 %v2945_v57, %v525_v59  ;;  %v2328_v45 = vpack.c.bf16 %v1145_v44, %v1144_v43  ;;  %v1225_v48 = vlaneseq }
 0x192   : > { %v620_v22 = vadd.f32 1e-05, %v612_v55  ;;  %v619_v60 = vadd.f32 1e-05, %v611_v56  ;;  %v2417_v62 = vpop.eup %2416  ;;  %v2011_v56 = vld [vmem:[%s3300_s10] ss:$0 sm:$0xff] }
 0x193   : > { %v2419_v2 = vpop.eup %2418  ;;  %v629_v3 = vmul.f32 %v2417_v62, %v2836_v30  ;;  %2136 = vmatmul.mubr.msk.f32.vlgmr.msra.gmra.mrb[0].mxu0 %vm504_vm0, %v532_v63  ;;  %2151 = vmatmul.mubr.msk.f32.vlgmr.msra.gmra.mrb[0].mxu1 %vm504_vm0, %v532_v63  ;;  %v669_v30 = vld [vmem:[%s3297_s7 + $0x20] sm:$0xff]  ;;  %v1226_v52 = vshrl.u32 %v1225_v48, 7 }
 0x194   : > { %2428 = vrsqrt.f32 %v619_v60  ;;  %2290 = vmatpush3.bf16.msra.mxu0 %v2289_v61  ;;  %2300 = vmatpush3.bf16.msra.mxu1 %v2887_v5  ;;  %v630_v9 = vmul.f32 %v2419_v2, %v2830_v23  ;;  %v2295_v13 = vpack.c.bf16 %v670_v10, %v669_v30 }
 0x195   : > { %2430 = vrsqrt.f32 %v620_v22  ;;  %v637_v7 = vmul.f32 %v2933_v47, %v629_v3  ;;  %2291 = vmatprep.subr.bf16.mxu0 %v2587_v4  ;;  %2302 = vmatprep.subr.bf16.mxu1 %v2904_v11 }
 0x196   : > { %v2421_v8 = vpop.eup %2420  ;;  %2165 = vmatprep.mubr.msk.f32.mxu0 %vm2588_vm1, %v2589_v18  ;;  %v638_v15 = vmul.f32 %v2933_v47, %v630_v9 }
 0x197   : > { %v2423_v12 = vpop.eup %2422  ;;  %v645_v5 = vadd.f32 %v2945_v57, %v637_v7  ;;  %v631_v23 = vmul.f32 %v2421_v8, %v2838_v31 }
 0x198   : > { %2293 = vmatpush3.bf16.msra.mxu0 %v2292_v6  ;;  %2304 = vmatpush3.bf16.msra.mxu1 %v2904_v11  ;;  %v632_v16 = vmul.f32 %v2423_v12, %v2846_v40  ;;  %v1140_v11 = vld [vmem:[%s3294_s4] sm:$0xff]  ;;  %v646_v40 = vadd.f32 %v2945_v57, %v638_v15 }
 0x199   : > { %2180 = vmatprep.mubr.msk.f32.mxu1 %vm504_vm0, %v645_v5  ;;  %2294 = vmatprep.subr.bf16.mxu0 %v2587_v4  ;;  %v639_v20 = vmul.f32 %v2933_v47, %v631_v23  ;;  %v2322_v32 = vpack.c.bf16 %v1141_v21, %v1140_v11 }
 0x19a   : > { %v2425_v14 = vpop.eup %2424  ;;  %2306 = vmatprep.subr.bf16.mxu1 %v2921_v17  ;;  %v640_v25 = vmul.f32 %v2933_v47, %v632_v16 }
 0x19b   : > { %v2427_v19 = vpop.eup %2426  ;;  %v633_v31 = vmul.f32 %v2425_v14, %v2848_v41  ;;  %v647_v27 = vadd.f32 %v2945_v57, %v639_v20 }
 0x19c   : > { %2296 = vmatpush3.bf16.msra.mxu0 %v2295_v13  ;;  %2308 = vmatpush3.bf16.msra.mxu1 %v2921_v17  ;;  %v634_v26 = vmul.f32 %v2427_v19, %v2856_v50  ;;  %v648_v50 = vadd.f32 %v2945_v57, %v640_v25 }
 0x19d   : > { %2310 = vmatprep.subr.bf16.mxu0 %v2289_v61  ;;  %2321 = vmatprep.subr.bf16.mxu1 %v2587_v4  ;;  %v641_v28 = vmul.f32 %v2933_v47, %v633_v31 }
 0x19e   : > { %v2429_v24 = vpop.eup %2428  ;;  %v642_v17 = vmul.f32 %v2933_v47, %v634_v26 }
 0x19f   : > { %v2431_v41 = vpop.eup %2430  ;;  %v635_v29 = vmul.f32 %v2429_v24, %v2858_v51  ;;  %2166 = vmatmul.mubr.msk.f32.vlgmr.msra.gmra.mrb[2].mxu0 %vm504_vm0, %v532_v63  ;;  %2181 = vmatmul.mubr.msk.f32.vlgmr.msra.gmra.mrb[2].mxu1 %vm504_vm0, %v646_v40  ;;  %v649_v34 = vadd.f32 %v2945_v57, %v641_v28 }
 0x1a0   : > { %2183 = vmatprep.mubr.msk.f32.mxu1 %vm504_vm0, %v647_v27  ;;  %2312 = vmatpush3.bf16.msra.mxu0 %v2289_v61  ;;  %v636_v33 = vmul.f32 %v2431_v41, %v2866_v58  ;;  %v650_v35 = vadd.f32 %v2945_v57, %v642_v17 }
 0x1a1   : > { %2204 = vmatprep.mubr.msk.f32.mxu0 %vm504_vm0, %v645_v5  ;;  %2314 = vmatprep.subr.bf16.mxu0 %v2292_v6  ;;  %v643_v51 = vmul.f32 %v2933_v47, %v635_v29 }
 0x1a2   : > { %2323 = vmatpush3.bf16.msra.mxu1 %v2322_v32  ;;  %v644_v36 = vmul.f32 %v2933_v47, %v636_v33  ;;  %v1223_v47 = vunpack.c.l.s4 %v2590_v46 }
 0x1a3   : > { %2184 = vmatmul.mubr.msk.f32.gmra.mrb[4].mxu1 %vm504_vm0, %v648_v50  ;;  %2324 = vmatprep.subr.bf16.mxu1 %v2587_v4  ;;  %v651_v37 = vadd.f32 %v2945_v57, %v643_v51 }
 0x1a4   : > { %2186 = vmatprep.mubr.msk.f32.mxu1 %vm504_vm0, %v649_v34  ;;  %2316 = vmatpush3.bf16.msra.mxu0 %v2292_v6  ;;  %v652_v58 = vadd.f32 %v2945_v57, %v644_v36  ;;  %v1224_v49 = vunpack.c.0.s8 %v1223_v47  ;;  %v3050_v6 = vsub.s32 0, %v1226_v52 }
 0x1a5   : > { %2318 = vmatprep.subr.bf16.mxu0 %v2295_v13 }
 0x1a6   : > { %2326 = vmatpush3.bf16.msra.mxu1 %v2325_v42  ;;  %v3043_v59 = vsub.s32 %v1224_v49, %v1226_v52 }
 0x1a7   : > { %2187 = vmatmul.mubr.msk.f32.gmra.mrb[6].mxu1 %vm504_vm0, %v650_v35  ;;  %2327 = vmatprep.subr.bf16.mxu1 %v2587_v4 }
 0x1a8   : > { %2189 = vmatprep.mubr.msk.f32.mxu1 %vm504_vm0, %v651_v37  ;;  %2320 = vmatpush3.bf16.msra.mxu0 %v2295_v13 }
 0x1a9   : > { %2331 = vmatprep.subr.bf16.mxu0 %v2322_v32 }
 0x1aa   : > { %2329 = vmatpush3.bf16.msra.mxu1 %v2328_v45 }
 0x1ab   : > { %2190 = vmatmul.mubr.msk.f32.gmra.mrb[8].mxu1 %vm504_vm0, %v652_v58  ;;  %2205 = vmatmul.mubr.msk.f32.vlgmr.msra.gmra.mrb[4].mxu0 %vm504_vm0, %v646_v40 }
 0x1ac   : > { %2207 = vmatprep.mubr.msk.f32.mxu0 %vm504_vm0, %v647_v27  ;;  %2333 = vmatpush3.bf16.msra.mxu0 %v2322_v32 }
 0x1ad   : > { %2228 = vmatprep.mubr.msk.f32.mxu1 %vm2588_vm1, %v2589_v18  ;;  %2335 = vmatprep.subr.bf16.mxu0 %v2325_v42 }
 0x1ae   : > { %2342 = vmatprep.subr.bf16.mxu1 %v2587_v4 }
 0x1af   : > { %2208 = vmatmul.mubr.msk.f32.gmra.mrb[6].mxu0 %vm504_vm0, %v648_v50 }
 0x1b0   : > { %2210 = vmatprep.mubr.msk.f32.mxu0 %vm504_vm0, %v649_v34  ;;  %2337 = vmatpush3.bf16.msra.mxu0 %v2325_v42 }
 0x1b1   : > { %2339 = vmatprep.subr.bf16.mxu0 %v2328_v45 }
 0x1b3   : > { %2211 = vmatmul.mubr.msk.f32.gmra.mrb[8].mxu0 %vm504_vm0, %v650_v35 }
 0x1b4   : > { %2213 = vmatprep.mubr.msk.f32.mxu0 %vm504_vm0, %v651_v37  ;;  %2341 = vmatpush3.bf16.msra.mxu0 %v2328_v45 }
 0x1b7   : > { %2214 = vmatmul.mubr.msk.f32.gmra.mrb[10].mxu0 %vm504_vm0, %v652_v58 }
 0x266   : > { %v749_v54 = vpop.f32.mrb[0].mxu0  ;;  %v826_v55 = vpop.f32.mrb[0].mxu1 }
 0x267   : > { %v750_v57 = vadd.f32 %v2009_v53, %v749_v54  ;;  %v2137_v22 = vpop.f32.mrb[1].mxu0  ;;  %v2152_v60 = vpop.f32.mrb[1].mxu1  ;;  %v827_v62 = vadd.f32 %v2011_v56, %v826_v55 }
 0x268   : > { %v1802_v22 = vld [vmem:[#allocation5 + $0x8] sm:$0xff]  ;;  %v1803_v60 = vld [vmem:[#allocation5 + $0x10] sm:$0xff] }
 0x269   : > { %v753_v61 = vmul.f32 0.25, %v750_v57  ;;  %v1801_v57 = vld [vmem:[#allocation5] sm:$0xff] }
 0x26b   : > { %v1221_v63 = vcombine.high %v753_v61, %v753_v61  ;;  %v1228_v0 = vrot.slane %v753_v61, %v3043_v59  ;;  %v1146_v1 = vmul.f32 %v827_v62, %v753_v61  ;;  %v2343_v61 = vpack.c.bf16 %v1802_v22, %v1801_v57  ;;  %v1804_v62 = vld [vmem:[#allocation5 + $0x18] sm:$0xff] }
 0x26d   : > { %v1236_v2 = vcombine.high %v1228_v0, %v1228_v0  ;;  %2229 = vmatmul.mubr.msk.f32.vlgmr.msra.gmra.mrb[10].mxu1 %vm504_vm0, %v1146_v1  ;;  %v1235_v3 = vrot.slane %v1221_v63, %v3043_v59  ;;  %v1244_v8 = vrot.slane %v1228_v0, %v3043_v59  ;;  %v2346_v63 = vpack.c.bf16 %v1804_v62, %v1803_v60  ;;  %v1805_v0 = vld [vmem:[#allocation5 + $0x20] sm:$0xff]  ;;  %v1806_v1 = vld [vmem:[#allocation5 + $0x28] sm:$0xff] }
 0x26e   : > { %2267 = vmatprep.mubr.msk.f32.mxu1 %vm2588_vm1, %v2589_v18  ;;  %2344 = vmatpush3.bf16.msra.mxu1 %v2343_v61 }
 0x26f   : > { %v1258_v7 = vrot.slane %v1236_v2, %v3043_v59  ;;  %v1237_v14 = vcombine.high %v1235_v3, %v1235_v3  ;;  %v1273_v18 = vrot.slane %v1244_v8, %v3050_v6  ;;  %v1266_v16 = vcombine.high %v1244_v8, %v1244_v8  ;;  %2345 = vmatprep.subr.bf16.mxu1 %v2587_v4 }
 0x270   : > { %v1251_v41 = vrot.slane %v1235_v3, %v3043_v59  ;;  %v2349_v2 = vpack.c.bf16 %v1806_v1, %v1805_v0 }
 0x271   : > { %v1277_v9 = vrot.slane %v1258_v7, %v3050_v6  ;;  %v1268_v13 = vcombine.high %v1258_v7, %v1258_v7  ;;  %v1265_v40 = vrot.slane %v1237_v14, %v3043_v59  ;;  %v1281_v26 = vrot.slane %v1266_v16, %v3050_v6 }
 0x272   : > { %v3055_v30 = vpop.f32.mrb[2].mxu0  ;;  %v2182_v10 = vpop.f32.mrb[2].mxu1  ;;  %v1289_v51 = vrot.slane %v1251_v41, %v3050_v6  ;;  %v1267_v35 = vcombine.high %v1251_v41, %v1251_v41  ;;  %2347 = vmatpush3.bf16.msra.mxu1 %v2346_v63 }
 0x273   : > { %v1002_v12 = vadd.f32 %v2182_v10, %v2011_v56  ;;  %v2167_v5 = vpop.f32.mrb[3].mxu0  ;;  %v996_v23 = vpop.f32.mrb[3].mxu1  ;;  %v1285_v21 = vrot.slane %v1268_v13, %v3050_v6  ;;  %v1293_v50 = vrot.slane %v1265_v40, %v3050_v6  ;;  %v1269_v33 = vcombine.high %v1265_v40, %v1265_v40  ;;  %2348 = vmatprep.subr.bf16.mxu1 %v2587_v4 }
 0x274   : > { %v997_v15 = vadd.f32 %v2011_v56, %v996_v23  ;;  %v1297_v46 = vrot.slane %v1267_v35, %v3050_v6 }
 0x275   : > { %v1311_v19 = vmul.f32 %v1277_v9, %v1002_v12  ;;  %v1301_v42 = vrot.slane %v1269_v33, %v3050_v6 }
 0x276   : > { %v1310_v20 = vmul.f32 %v1273_v18, %v997_v15  ;;  %v2185_v31 = vpop.f32.mrb[4].mxu1  ;;  %2350 = vmatpush3.bf16.msra.mxu1 %v2349_v2 }
 0x277   : > { %v1012_v11 = vadd.f32 %v2185_v31, %v2011_v56  ;;  %v1006_v24 = vpop.f32.mrb[5].mxu1 }
 0x278   : > { %v1007_v25 = vadd.f32 %v2011_v56, %v1006_v24  ;;  %2243 = vmatprep.mubr.msk.f32.mxu0 %vm504_vm0, %v1310_v20 }
 0x279   : > { %v1313_v27 = vmul.f32 %v1285_v21, %v1012_v11  ;;  %2244 = vmatmul.mubr.msk.f32.vlgmr.msra.gmra.mrb[12].mxu0 %vm504_vm0, %v1311_v19 }
 0x27a   : > { %v1312_v28 = vmul.f32 %v1281_v26, %v1007_v25  ;;  %v2188_v29 = vpop.f32.mrb[6].mxu1 }
 0x27b   : > { %v1022_v32 = vadd.f32 %v2188_v29, %v2011_v56  ;;  %v1016_v17 = vpop.f32.mrb[7].mxu1 }
 0x27c   : > { %v1017_v34 = vadd.f32 %v2011_v56, %v1016_v17  ;;  %2246 = vmatprep.mubr.msk.f32.mxu0 %vm504_vm0, %v1312_v28 }
 0x27d   : > { %v1315_v36 = vmul.f32 %v1293_v50, %v1022_v32  ;;  %2247 = vmatmul.mubr.msk.f32.gmra.mrb[14].mxu0 %vm504_vm0, %v1313_v27 }
 0x27e   : > { %v1314_v37 = vmul.f32 %v1289_v51, %v1017_v34  ;;  %v2191_v58 = vpop.f32.mrb[8].mxu1  ;;  %v3068_v38 = vpop.f32.mrb[4].mxu0 }
 0x27f   : > { %v1032_v39 = vadd.f32 %v2191_v58, %v2011_v56  ;;  %v1026_v43 = vpop.f32.mrb[9].mxu1  ;;  %v3071_v44 = vpop.f32.mrb[5].mxu0 }
 0x280   : > { %v1027_v45 = vadd.f32 %v2011_v56, %v1026_v43  ;;  %2249 = vmatprep.mubr.msk.f32.mxu0 %vm504_vm0, %v1314_v37 }
 0x281   : > { %v1317_v47 = vmul.f32 %v1301_v42, %v1032_v39  ;;  %2250 = vmatmul.mubr.msk.f32.gmra.mrb[16].mxu0 %vm504_vm0, %v1315_v36 }
 0x282   : > { %v1316_v48 = vmul.f32 %v1297_v46, %v1027_v45  ;;  %v3076_v49 = vpop.f32.mrb[6].mxu0 }
 0x283   : > { %v3078_v52 = vpop.f32.mrb[7].mxu0 }
 0x284   : > { %2252 = vmatprep.mubr.msk.f32.mxu0 %vm504_vm0, %v1316_v48 }
 0x285   : > { %2253 = vmatmul.mubr.msk.f32.gmra.mrb[18].mxu0 %vm504_vm0, %v1317_v47 }
 0x286   : > { %v3082_v53 = vpop.f32.mrb[8].mxu0 }
 0x287   : > { %v3084_v54 = vpop.f32.mrb[9].mxu0 }
 0x28a   : > { %v3086_v55 = vpop.f32.mrb[10].mxu0 }
 0x28b   : > { %v3088_v56 = vpop.f32.mrb[11].mxu0 }
 0x340   : > { %v3092_v3 = vpop.f32.mrb[10].mxu1 }
 0x341   : > { %v2230_v7 = vpop.f32.mrb[11].mxu1 }
 0x34c   : > { %v3094_v8 = vpop.f32.mrb[12].mxu0 }
 0x34d   : > { %v1454_v9 = vsel %vm504_vm0, %v3094_v8, -inf  ;;  %v3098_v10 = vpop.f32.mrb[13].mxu0 }
 0x34e   : > { %v1455_v12 = vrot.slane %v1454_v9, 4  ;;  %v1447_v5 = vsel %vm504_vm0, %v3098_v10, -inf }
 0x34f   : > { %v1448_v23 = vrot.slane %v1447_v5, 4 }
 0x350   : > { %v1456_v13 = vmax.f32 %v1454_v9, %v1455_v12  ;;  %v3102_v14 = vpop.f32.mrb[14].mxu0 }
 0x351   : > { %v1449_v4 = vmax.f32 %v1447_v5, %v1448_v23  ;;  %v1468_v15 = vsel %vm504_vm0, %v3102_v14, -inf  ;;  %v3106_v18 = vpop.f32.mrb[15].mxu0 }
 0x352   : > { %v1457_v16 = vrot.slane %v1456_v13, 2  ;;  %v1469_v19 = vrot.slane %v1468_v15, 4  ;;  %v1461_v20 = vsel %vm504_vm0, %v3106_v18, -inf }
 0x353   : > { %v1450_v31 = vrot.slane %v1449_v4, 2  ;;  %v1462_v11 = vrot.slane %v1461_v20, 4 }
 0x354   : > { %v1458_v21 = vmax.f32 %v1456_v13, %v1457_v16  ;;  %v1470_v24 = vmax.f32 %v1468_v15, %v1469_v19  ;;  %v3110_v40 = vpop.f32.mrb[16].mxu0 }
 0x355   : > { %v1451_v25 = vmax.f32 %v1449_v4, %v1450_v31  ;;  %v1463_v26 = vmax.f32 %v1461_v20, %v1462_v11  ;;  %v1482_v41 = vsel %vm504_vm0, %v3110_v40, -inf  ;;  %v3114_v27 = vpop.f32.mrb[17].mxu0 }
 0x356   : > { %v1459_v28 = vrot.slane %v1458_v21, 1  ;;  %v1471_v29 = vrot.slane %v1470_v24, 2  ;;  %v1483_v32 = vrot.slane %v1482_v41, 4  ;;  %v1475_v50 = vsel %vm504_vm0, %v3114_v27, -inf }
 0x357   : > { %v1452_v17 = vrot.slane %v1451_v25, 1  ;;  %v1464_v33 = vrot.slane %v1463_v26, 2  ;;  %v1476_v34 = vrot.slane %v1475_v50, 4 }
 0x358   : > { %v1460_v51 = vmax.f32 %v1458_v21, %v1459_v28  ;;  %v1472_v35 = vmax.f32 %v1470_v24, %v1471_v29  ;;  %v1484_v36 = vmax.f32 %v1482_v41, %v1483_v32  ;;  %v3118_v37 = vpop.f32.mrb[18].mxu0 }
 0x359   : > { %v1453_v58 = vmax.f32 %v1451_v25, %v1452_v17  ;;  %v1465_v39 = vmax.f32 %v1463_v26, %v1464_v33  ;;  %v1477_v42 = vmax.f32 %v1475_v50, %v1476_v34  ;;  %v1496_v43 = vsel %vm504_vm0, %v3118_v37, -inf  ;;  %v3122_v45 = vpop.f32.mrb[19].mxu0 }
 0x35a   : > { %v1473_v46 = vrot.slane %v1472_v35, 1  ;;  %v1485_v47 = vrot.slane %v1484_v36, 2  ;;  %v1497_v48 = vrot.slane %v1496_v43, 4  ;;  %v1489_v57 = vsel %vm504_vm0, %v3122_v45, -inf }
 0x35b   : > { %v1512_v22 = vsel %vm1511_vm2, %v1460_v51, %v1453_v58  ;;  %v1466_v60 = vrot.slane %v1465_v39, 1  ;;  %v1478_v61 = vrot.slane %v1477_v42, 2  ;;  %v1490_v62 = vrot.slane %v1489_v57, 4 }
 0x35c   : > { %v1486_v63 = vmax.f32 %v1484_v36, %v1485_v47  ;;  %v1498_v0 = vmax.f32 %v1496_v43, %v1497_v48  ;;  %v1474_v9 = vmax.f32 %v1472_v35, %v1473_v46 }
 0x35d   : > { %v1467_v1 = vmax.f32 %v1465_v39, %v1466_v60  ;;  %v1479_v2 = vmax.f32 %v1477_v42, %v1478_v61  ;;  %v1491_v7 = vmax.f32 %v1489_v57, %v1490_v62 }
 0x35e   : > { %v1487_v12 = vrot.slane %v1486_v63, 1  ;;  %v1499_v5 = vrot.slane %v1498_v0, 2 }
 0x35f   : > { %v1514_v23 = vsel %vm1513_vm3, %v1467_v1, %v1512_v22  ;;  %v1480_v13 = vrot.slane %v1479_v2, 1  ;;  %v1492_v4 = vrot.slane %v1491_v7, 2 }
 0x360   : > { %v1516_v15 = vsel %vm1515_vm4, %v1474_v9, %v1514_v23  ;;  %v1500_v16 = vmax.f32 %v1498_v0, %v1499_v5  ;;  %v1488_v31 = vmax.f32 %v1486_v63, %v1487_v12  ;;  %v3155_v12 = vld [vmem:[%s3329_s11] ss:$0 sm:$0xff]  ;;  %s2511_s11 = scalar_lea.vmem %s3247_s22, 128 }
 0x361   : > { %v1481_v19 = vmax.f32 %v1479_v2, %v1480_v13  ;;  %v1493_v20 = vmax.f32 %v1491_v7, %v1492_v4  ;;  %p2512_p6 = scmp.ne.s32.totalorder %s3247_s22, %s2511_s11 }
 0x362   : > { %v1501_v11 = vrot.slane %v1500_v16, 1 }
 0x363   : > { %v1518_v21 = vsel %vm1517_vm5, %v1481_v19, %v1516_v15  ;;  %v1494_v24 = vrot.slane %v1493_v20, 1  ;;  %p2513_p8 = pnand %p2512_p6, %p2753_p12 }
 0x364   : > { %v1520_v25 = vsel %vm1519_vm6, %v1488_v31, %v1518_v21  ;;  %v1502_v41 = vmax.f32 %v1500_v16, %v1501_v11  ;;  %v903_v16 = vadd.f32 %v3155_v12, %v3055_v30  ;;  %v1107_v30 = vadd.f32 %v3068_v38, %v3155_v12 }
 0x365   : > { %v1495_v26 = vmax.f32 %v1493_v20, %v1494_v24  ;;  %v1117_v31 = vadd.f32 %v3076_v49, %v3155_v12  ;;  %v1132_v38 = vadd.f32 %v3155_v12, %v3088_v56  ;;  %p2514_p10 = pneg %p2513_p8 }
 0x367   : > { %v1522_v28 = vsel %vm1521_vm7, %v1495_v26, %v1520_v25  ;;  %v1112_v25 = vadd.f32 %v3155_v12, %v3078_v52  ;;  %v1127_v26 = vadd.f32 %v3082_v53, %v3155_v12 }
 0x368   : > { %v1524_v29 = vsel %vm1523_vm8, %v1502_v41, %v1522_v28 }
 0x369   : > { %v1526_v32 = vmax.f32 %v3092_v3, %v1524_v29 }
 0x36b   : > { %v1527_v50 = vsub.f32 %v3092_v3, %v1526_v32  ;;  %v1531_v17 = vcombine.high %v1526_v32, %v1526_v32  ;;  %v1538_v33 = vrot.slane %v1526_v32, %v3043_v59 }
 0x36d   : > { %v1528_v34 = vmul.f32 1.442695, %v1527_v50  ;;  %v1545_v51 = vrot.slane %v1531_v17, %v3043_v59  ;;  %v1546_v35 = vcombine.high %v1538_v33, %v1538_v33  ;;  %v1554_v36 = vrot.slane %v1538_v33, %v3043_v59 }
 0x36f   : > { %2432 = vpow2.f32 %v1528_v34  ;;  %v1547_v58 = vcombine.high %v1545_v51, %v1545_v51  ;;  %v1561_v39 = vrot.slane %v1545_v51, %v3043_v59  ;;  %v1568_v42 = vrot.slane %v1546_v35, %v3043_v59 }
 0x370   : > { %v1576_v43 = vcombine.high %v1554_v36, %v1554_v36  ;;  %v1583_v46 = vrot.slane %v1554_v36, %v3050_v6 }
 0x371   : > { %v1575_v3 = vrot.slane %v1547_v58, %v3043_v59  ;;  %v1577_v47 = vcombine.high %v1561_v39, %v1561_v39  ;;  %v1578_v48 = vcombine.high %v1568_v42, %v1568_v42  ;;  %v1587_v57 = vrot.slane %v1568_v42, %v3050_v6 }
 0x372   : > { %v1591_v22 = vrot.slane %v1576_v43, %v3050_v6  ;;  %v1599_v60 = vrot.slane %v1561_v39, %v3050_v6  ;;  %v1620_v61 = vsub.f32 %v3098_v10, %v1583_v46 }
 0x373   : > { %v1579_v62 = vcombine.high %v1575_v3, %v1575_v3  ;;  %v1595_v63 = vrot.slane %v1578_v48, %v3050_v6  ;;  %v1603_v0 = vrot.slane %v1575_v3, %v3050_v6  ;;  %v1607_v1 = vrot.slane %v1577_v47, %v3050_v6 }
 0x374   : > { %v1621_v2 = vsub.f32 %v3094_v8, %v1587_v57  ;;  %v1622_v59 = vsub.f32 %v3106_v18, %v1591_v22  ;;  %v1624_v7 = vsub.f32 %v3114_v27, %v1599_v60  ;;  %v1628_v9 = vmul.f32 1.442695, %v1620_v61 }
 0x375   : > { %v1611_v10 = vrot.slane %v1579_v62, %v3050_v6  ;;  %v1623_v5 = vsub.f32 %v3102_v14, %v1595_v63  ;;  %v1625_v23 = vsub.f32 %v3110_v40, %v1603_v0  ;;  %v1626_v13 = vsub.f32 %v3122_v45, %v1607_v1 }
 0x376   : > { %2434 = vpow2.f32 %v1628_v9  ;;  %v1630_v8 = vmul.f32 1.442695, %v1621_v2  ;;  %v1632_v4 = vmul.f32 1.442695, %v1622_v59  ;;  %v1636_v15 = vmul.f32 1.442695, %v1624_v7 }
 0x377   : > { %v1627_v18 = vsub.f32 %v3118_v37, %v1611_v10  ;;  %v1634_v27 = vmul.f32 1.442695, %v1623_v5  ;;  %v1638_v19 = vmul.f32 1.442695, %v1625_v23  ;;  %v1640_v6 = vmul.f32 1.442695, %v1626_v13 }
 0x378   : > { %2436 = vpow2.f32 %v1630_v8  ;;  %v1102_v37 = vadd.f32 %v3155_v12, %v3071_v44  ;;  %v1122_v44 = vadd.f32 %v3155_v12, %v3084_v54 }
 0x379   : > { %v3164_v20 = vpop.eup %2432  ;;  %2438 = vpow2.f32 %v1632_v4  ;;  %v1642_v14 = vmul.f32 1.442695, %v1627_v18 }
 0x37a   : > { %2440 = vpow2.f32 %v1634_v27  ;;  %v3167_v40 = vmul.f32 %v3164_v20, %v903_v16 }
 0x37b   : > { %2442 = vpow2.f32 %v1636_v15 }
 0x37c   : > { %2444 = vpow2.f32 %v1638_v19 }
 0x37d   : > { %2446 = vpow2.f32 %v1640_v6 }
 0x37e   : > { %2448 = vpow2.f32 %v1642_v14 }
 0x380   : > { %v2435_v45 = vpop.eup %2434 }
 0x381   : > { %v1644_v11 = vsel %vm504_vm0, %v2435_v45, 0.0  ;;  %v1719_v21 = vmul.f32 %v2435_v45, %v1102_v37 }
 0x382   : > { %v2437_v24 = vpop.eup %2436  ;;  %v1645_v41 = vrot.slane %v1644_v11, 4 }
 0x383   : > { %v2439_v28 = vpop.eup %2438  ;;  %v1651_v49 = vsel %vm504_vm0, %v2437_v24, 0.0  ;;  %v3185_v29 = vmul.f32 %v2437_v24, %v1107_v30  ;;  %v3188_v32 = vsel %vm504_vm0, %v1719_v21, 0.0 }
 0x384   : > { %v2441_v50 = vpop.eup %2440  ;;  %v1646_v52 = vadd.f32 %v1645_v41, %v1644_v11  ;;  %v1652_v17 = vrot.slane %v1651_v49, 4  ;;  %v1658_v53 = vsel %vm504_vm0, %v2439_v28, 0.0  ;;  %v3191_v33 = vmul.f32 %v2439_v28, %v1112_v25 }
 0x385   : > { %v2443_v54 = vpop.eup %2442  ;;  %v1659_v34 = vrot.slane %v1658_v53, 4  ;;  %v1665_v51 = vsel %vm504_vm0, %v2441_v50, 0.0  ;;  %v3194_v35 = vmul.f32 %v2441_v50, %v1117_v31  ;;  %v1728_v56 = vrot.slane %v3188_v32, 4 }
 0x386   : > { %v2445_v36 = vpop.eup %2444  ;;  %v1647_v58 = vrot.slane %v1646_v52, 2  ;;  %v1653_v39 = vadd.f32 %v1652_v17, %v1651_v49  ;;  %v1666_v42 = vrot.slane %v1665_v51, 4  ;;  %v1672_v43 = vsel %vm504_vm0, %v2443_v54, 0.0 }
 0x387   : > { %v2447_v46 = vpop.eup %2446  ;;  %v1660_v3 = vadd.f32 %v1659_v34, %v1658_v53  ;;  %v1673_v47 = vrot.slane %v1672_v43, 4  ;;  %v1679_v48 = vsel %vm504_vm0, %v2445_v36, 0.0  ;;  %v1723_v57 = vmul.f32 %v2443_v54, %v1122_v44 }
 0x388   : > { %v3199_v22 = vpop.eup %2448  ;;  %v1648_v60 = vadd.f32 %v1647_v58, %v1646_v52  ;;  %v1654_v61 = vrot.slane %v1653_v39, 2  ;;  %v1667_v62 = vadd.f32 %v1666_v42, %v1665_v51  ;;  %v1680_v63 = vrot.slane %v1679_v48, 4 }
 0x389   : > { %v1661_v0 = vrot.slane %v1660_v3, 2  ;;  %v1674_v1 = vadd.f32 %v1673_v47, %v1672_v43  ;;  %v1686_v2 = vsel %vm504_vm0, %v2447_v46, 0.0  ;;  %v1693_v59 = vsel %vm504_vm0, %v3199_v22, 0.0 }
 0x38a   : > { %v1649_v7 = vrot.slane %v1648_v60, 1  ;;  %v1655_v9 = vadd.f32 %v1654_v61, %v1653_v39  ;;  %v1668_v10 = vrot.slane %v1667_v62, 2  ;;  %v1681_v5 = vadd.f32 %v1680_v63, %v1679_v48 }
 0x38b   : > { %v1662_v23 = vadd.f32 %v1661_v0, %v1660_v3  ;;  %v1675_v13 = vrot.slane %v1674_v1, 2  ;;  %v1687_v8 = vrot.slane %v1686_v2, 4  ;;  %v1694_v4 = vrot.slane %v1693_v59, 4 }
 0x38c   : > { %v1650_v18 = vadd.f32 %v1649_v7, %v1648_v60  ;;  %v1656_v27 = vrot.slane %v1655_v9, 1  ;;  %v1669_v15 = vadd.f32 %v1668_v10, %v1667_v62  ;;  %v1682_v16 = vrot.slane %v1681_v5, 2 }
 0x38d   : > { %v1663_v19 = vrot.slane %v1662_v23, 1  ;;  %v1676_v6 = vadd.f32 %v1675_v13, %v1674_v1  ;;  %v1688_v14 = vadd.f32 %v1687_v8, %v1686_v2  ;;  %v1695_v37 = vadd.f32 %v1694_v4, %v1693_v59 }
 0x38e   : > { %v1657_v45 = vadd.f32 %v1656_v27, %v1655_v9  ;;  %v1670_v30 = vrot.slane %v1669_v15, 1  ;;  %v1683_v31 = vadd.f32 %v1682_v16, %v1681_v5  ;;  %v1724_v11 = vmul.f32 %v2445_v36, %v1127_v26 }
 0x38f   : > { %v1664_v21 = vadd.f32 %v1663_v19, %v1662_v23  ;;  %v1677_v24 = vrot.slane %v1676_v6, 1  ;;  %v1689_v25 = vrot.slane %v1688_v14, 2  ;;  %v1696_v44 = vrot.slane %v1695_v37, 2 }
 0x390   : > { %v1671_v41 = vadd.f32 %v1670_v30, %v1669_v15  ;;  %v1684_v28 = vrot.slane %v1683_v31, 1  ;;  %v1708_v49 = vsel %vm1511_vm2, %v1657_v45, %v1650_v18  ;;  %v1725_v50 = vmul.f32 %v2447_v46, %v1132_v38 }
 0x391   : > { %v1678_v52 = vadd.f32 %v1677_v24, %v1676_v6  ;;  %v1690_v17 = vadd.f32 %v1689_v25, %v1688_v14  ;;  %v1697_v53 = vadd.f32 %v1696_v44, %v1695_v37  ;;  %v1709_v54 = vsel %vm1513_vm3, %v1664_v21, %v1708_v49 }
 0x392   : > { %v1685_v34 = vadd.f32 %v1684_v28, %v1683_v31  ;;  %v1710_v51 = vsel %vm1515_vm4, %v1671_v41, %v1709_v54  ;;  %v1729_v58 = vadd.f32 %v1728_v56, %v3188_v32  ;;  %v1734_v26 = vsel %vm504_vm0, %v3185_v29, 0.0 }
 0x393   : > { %v1691_v36 = vrot.slane %v1690_v17, 1  ;;  %v1698_v39 = vrot.slane %v1697_v53, 1  ;;  %v1711_v42 = vsel %vm1517_vm5, %v1678_v52, %v1710_v51  ;;  %v1735_v43 = vrot.slane %v1734_v26, 4 }
 0x394   : > { %v1712_v38 = vsel %vm1519_vm6, %v1685_v34, %v1711_v42  ;;  %v1730_v46 = vrot.slane %v1729_v58, 2  ;;  %v1741_v3 = vsel %vm504_vm0, %v3191_v33, 0.0  ;;  %v1748_v47 = vsel %vm504_vm0, %v3194_v35, 0.0 }
 0x395   : > { %v1692_v48 = vadd.f32 %v1691_v36, %v1690_v17  ;;  %v1699_v60 = vadd.f32 %v1698_v39, %v1697_v53  ;;  %v1736_v32 = vadd.f32 %v1735_v43, %v1734_v26  ;;  %v1742_v56 = vrot.slane %v1741_v3, 4 }
 0x396   : > { %v1731_v61 = vadd.f32 %v1730_v46, %v1729_v58  ;;  %v1749_v29 = vrot.slane %v1748_v47, 4  ;;  %v1755_v62 = vsel %vm504_vm0, %v1723_v57, 0.0  ;;  %v1762_v63 = vsel %vm504_vm0, %v1724_v11, 0.0 }
 0x397   : > { %v1713_v0 = vsel %vm1521_vm7, %v1692_v48, %v1712_v38  ;;  %v1737_v1 = vrot.slane %v1736_v32, 2  ;;  %v1743_v2 = vadd.f32 %v1742_v56, %v1741_v3  ;;  %v1756_v59 = vrot.slane %v1755_v62, 4 }
 0x398   : > { %v1714_v33 = vsel %vm1523_vm8, %v1699_v60, %v1713_v0  ;;  %v1732_v7 = vrot.slane %v1731_v61, 1  ;;  %v1750_v9 = vadd.f32 %v1749_v29, %v1748_v47  ;;  %v1763_v35 = vrot.slane %v1762_v63, 4 }
 0x399   : > { %v1716_v10 = vadd.f32 %v3164_v20, %v1714_v33  ;;  %v1738_v5 = vadd.f32 %v1737_v1, %v1736_v32  ;;  %v1744_v23 = vrot.slane %v1743_v2, 2  ;;  %v1757_v13 = vadd.f32 %v1756_v59, %v1755_v62  ;;  %v2040_v32 = vld [vmem:[%s3330_s16] ss:$0 sm:$0xff] }
 0x39a   : > { %v1137_v57 = vadd.f32 %v3086_v55, %v3155_v12  ;;  %v1751_v8 = vrot.slane %v1750_v9, 2  ;;  %v1764_v4 = vadd.f32 %v1763_v35, %v1762_v63  ;;  %v1769_v18 = vsel %vm504_vm0, %v1725_v50, 0.0  ;;  %v2452_v62 = vld [vmem:[%s2804_s19] sm:$0xff]  ;;  %s2515_s19 = sshll.u32 %s2591_s23, 4  ;;  %s2516_s19 = int_to_ptr.vmem [resolvable:$false] %s2515_s19 }
 0x39b   : > { %v1739_v27 = vrot.slane %v1738_v5, 1  ;;  %v1745_v15 = vadd.f32 %v1744_v23, %v1743_v2  ;;  %v1758_v16 = vrot.slane %v1757_v13, 2  ;;  %v1770_v14 = vrot.slane %v1769_v18, 4  ;;  %s2517_s12 = scalar_lea.vmem %s2516_s19, 256  ;;  %p2518_p13 = scmp.lt.s32.totalorder %s3247_s22, %s2516_s19 }
 0x39c   : > { %v1752_v19 = vadd.f32 %v1751_v8, %v1750_v9  ;;  %v1765_v6 = vrot.slane %v1764_v4, 2  ;;  %v1726_v37 = vmul.f32 %v3199_v22, %v1137_v57  ;;  %v1733_v45 = vadd.f32 %v1732_v7, %v1731_v61  ;;  %p2519_p3 = scmp.lt.s32.totalorder %s2517_s12, %s2511_s11 }
 0x39d   : > { %v1740_v20 = vadd.f32 %v1739_v27, %v1738_v5  ;;  %v1746_v30 = vrot.slane %v1745_v15, 1  ;;  %v1759_v31 = vadd.f32 %v1758_v16, %v1757_v13  ;;  %v1771_v24 = vadd.f32 %v1770_v14, %v1769_v18 }
 0x39e   : > { %v1753_v11 = vrot.slane %v1752_v19, 1  ;;  %v1766_v21 = vadd.f32 %v1765_v6, %v1764_v4  ;;  %v1776_v55 = vsel %vm504_vm0, %v1726_v37, 0.0  ;;  %2450 = vrcp.f32 %v1716_v10  ;;  %p2520_p7 = por %p2519_p3, %p2518_p13 }
 0x39f   : > { %v1747_v12 = vadd.f32 %v1746_v30, %v1745_v15  ;;  %v1760_v25 = vrot.slane %v1759_v31, 1  ;;  %v1791_v44 = vsel %vm1511_vm2, %v1740_v20, %v1733_v45  ;;  %v1777_v41 = vrot.slane %v1776_v55, 4 }
 0x3a0   : > { %v1754_v28 = vadd.f32 %v1753_v11, %v1752_v19  ;;  %v1767_v49 = vrot.slane %v1766_v21, 1  ;;  %v1772_v50 = vrot.slane %v1771_v24, 2  ;;  %p2521_p9 = pnand %p2520_p7, %p2514_p10 }
 0x3a1   : > { %v1761_v52 = vadd.f32 %v1760_v25, %v1759_v31  ;;  %v1792_v22 = vsel %vm1513_vm3, %v1747_v12, %v1791_v44  ;;  %v1778_v17 = vadd.f32 %v1777_v41, %v1776_v55 }
 0x3a2   : > { %v1768_v53 = vadd.f32 %v1767_v49, %v1766_v21  ;;  %v1773_v54 = vadd.f32 %v1772_v50, %v1771_v24  ;;  %v1793_v34 = vsel %vm1515_vm4, %v1754_v28, %v1792_v22 }
 0x3a3   : > { %v1794_v51 = vsel %vm1517_vm5, %v1761_v52, %v1793_v34  ;;  %v1779_v58 = vrot.slane %v1778_v17, 2 }
 0x3a4   : > { %v1774_v26 = vrot.slane %v1773_v54, 1  ;;  %v1795_v36 = vsel %vm1519_vm6, %v1768_v53, %v1794_v51 }
 0x3a5   : > { %v1780_v39 = vadd.f32 %v1779_v58, %v1778_v17 }
 0x3a6   : > { %v1775_v42 = vadd.f32 %v1774_v26, %v1773_v54 }
 0x3a7   : > { %v1781_v43 = vrot.slane %v1780_v39, 1 }
 0x3a8   : > { %v1796_v38 = vsel %vm1521_vm7, %v1775_v42, %v1795_v36  ;;  %v2451_v3 = vpop.eup %2450 }
 0x3a9   : > { %v1782_v46 = vadd.f32 %v1781_v43, %v1780_v39 }
 0x3ab   : > { %v1797_v47 = vsel %vm1523_vm8, %v1782_v46, %v1796_v38 }
 0x3ac   : > { %v1799_v48 = vadd.f32 %v1797_v47, %v3167_v40 }
 0x3ae   : > { %v1800_v60 = vmul.f32 %v2451_v3, %v1799_v48 }
 0x3b0   : > { %2268 = vmatmul.mubr.msk.f32.vlgmr.msra.gmra.mrb[12].mxu1 %vm504_vm0, %v1800_v60 }
 0x483   : > { %v1883_v56 = vpop.f32.mrb[12].mxu1 }
 0x484   : > { %v1884_v61 = vadd.f32 %v2040_v32, %v1883_v56  ;;  %v2269_v29 = vpop.f32.mrb[13].mxu1 }
 0x486   : > { %v1887_v63 = vadd.f32 %v2452_v62, %v1884_v61 }
 0x488   : > { %1888 = vst.msk [vmem:[%s486_s21] sm:$0xff] %vm504_vm0, %v1887_v63 }
 0x489   : > { %2524 = shalt.err (!%p2521_p9)
}
 0x48a   : > { %s2525_s13 = scalar_lea.hbm %s3245_s18, 128  ;;  %s2529_s25 = scalar_lea.hbm %s3331_s30, 256 }
 0x48b   : > { %p2526_p2 = scmp.ne.s32.totalorder %s3245_s18, %s2525_s13  ;;  %p2530_p11 = scmp.lt.u32.totalorder %s3245_s18, %s3331_s30 }
 0x48c   : > { %p2531_p1 = scmp.lt.u32.totalorder %s2529_s25, %s2525_s13  ;;  %p2533_p6 = scmp.lt.u32.totalorder %s2525_s13, %s3245_s18 }
 0x48d   : > { %p2527_p5 = pnand %p2526_p2, %p2753_p12 }
 0x48e   : > { %p2532_p4 = por %p2531_p1, %p2530_p11 }
 0x48f   : > { %p2528_p0 = pneg %p2527_p5 }
 0x490   : > { %p2534_p8 = por %p2533_p6, %p2532_p4 }
 0x492   : > { %p2535_p10 = pnand %p2534_p8, %p2528_p0 }
 0x494   : > { %2538 = shalt.err (!%p2535_p10)
}
 0x495   : > { %2357 = dma.vmem_to_hbm [thread:$0]  (%p2753_p12), %s3247_s22, 128, %s3245_s18, %s1890_s29  }
 0x496 PF: > { %s3332_s14 = sld [smem:[#allocation11_spill]]  ;;  %s3333_s11 = sld [smem:[#allocation12_spill]] }
 0x497   : > { %p3335_p3 = scmp.ge.s32.totalorder %s2581_s28, 2 }
 0x49c   : > { %s1915_s23 = sand.u32 1, %s3332_s14   ;;  %p3334_p13 = scmp.ne.s32.totalorder %s3333_s11, 0 }
 0x49d   : > { %s1916_s19 = scalar_lea.sflag [#allocation4], %s1915_s23 }
 0x49e   : > { %p2368_p7 = pnand %p3335_p3, %p3334_p13 }
 0x4a0   : > { %2564 = dma.done.wait (!%p2368_p7), %s1916_s19, 128  }
 0x4a1   : > { %2566 = vsyncadd (!%p2368_p7), %s1916_s19, 4294967168  ;;  %s3336_s28 = sld [smem:[#allocation13_spill]]  ;;  %s3337_s25 = smov %s2573_s26 }
 0x4a2   : > { %s3338_s26 = smov %s2577_s27  ;;  %s3339_s27 = smov %s2749_s20 }
 0x4a7   : > { %p27_p9 = scmp.ge.s32.totalorder %s3336_s28, 4  }
 0x4a9   :  { %29 = sbr.rel (!%p27_p9) target bundleno = 10 (0xa), region = 124 }
 0x4b0   :  { %1921 = vsyncpa [#allocation3], 1 }
 0x4b1   :  { %1923 = vsyncpa [#allocation3 + $0x1], 1 }
 0x4b2   :  { %1924 = vsyncpa [#allocation6], 1 }
 0x4b3   :  { %1925 = vsyncpa [#allocation4], 1 }
 0x4b4   :  { %1927 = vsyncpa [#allocation4 + $0x1], 1 }

</bundles_post_ra>
